<compile_context>
chip_gen: v5e
topology: v5e:2x2
jax: 0.10.0
libtpu: 0.0.40
codegen_flags: <defaults>
</compile_context>

<pallas_src>
import jax
import jax.numpy as jnp
from jax.experimental import pallas as pl
from jax.experimental.pallas import tpu as pltpu

# ---------------- static problem sizes (from the PyTorch module) ----------------
B = 2                    # batch
L = 48                   # sequence length (fc1 expects 36 * 12 -> L = 48)
L2, L4 = L // 2, L // 4  # 24, 12
C_IN, C1, C2 = 6, 18, 36
K = 3                    # conv kernel, padding=1, stride=1
F_IN = C2 * L4           # 432
F1, F2, F_OUT = 512, 128, 3
F_OUT_PAD = 128          # lane-dense output width (first 3 lanes are the real logits)

# packed-bias layout (lane-aligned slots inside one (1, 1024) f32 array)
OFF_B1, OFF_B2 = 0, 128
OFF_FB1, OFF_FB2, OFF_FB3 = 256, 768, 896
BIAS_W = 1024


def _vmem_specs(n):
    return [pl.BlockSpec(memory_space=pltpu.MemorySpace.VMEM) for _ in range(n)]


# ---------------- the single fused Pallas kernel ----------------

def fused_forward_kernel(x_ref, w1_ref, w2_ref, fw1_ref, fw2_ref, fw3_ref, b_ref,
                         out_ref, p1_ref, h1_ref, p2_ref, h2_ref, flat_ref):
    """Entire forward pass. Refs:
      x_ref   : (B*L, C_IN)        f32   input, channels-last rows (row = b*L + l)
      w1_ref  : (K*C_IN, C1)       bf16  conv1 weight, im2col layout
      w2_ref  : (K*C1, C2)         bf16  conv2 weight, im2col layout
      fw1_ref : (F_IN, F1)         bf16  fc1 weight, rows pre-permuted to position-major
      fw2_ref : (F1, F2)           bf16
      fw3_ref : (F2, F_OUT_PAD)    bf16  fc3 weight, columns zero-padded to 128
      b_ref   : (1, BIAS_W)        f32   all biases packed at 128-aligned offsets
      out_ref : (B, F_OUT_PAD)     f32   lane-dense output (first F_OUT lanes valid)
      scratch : p1 (B*L, K*C_IN), h1 (B*L, C1), p2 (B*L2, K*C1), h2 (B*L2, C2),
                flat (B, F_IN) -- all f32 VMEM
    """
    f32, bf16 = jnp.float32, jnp.bfloat16

    # ---------- conv1: im2col via static slice stores (zero init = the padding) ----
    p1_ref[...] = jnp.zeros_like(p1_ref)
    p1_ref[:, C_IN:2 * C_IN] = x_ref[...]                                # center tap
    for b in range(B):
        r = b * L
        p1_ref[r + 1:r + L, 0:C_IN] = x_ref[r:r + L - 1, :]              # tap l-1
        p1_ref[r:r + L - 1, 2 * C_IN:3 * C_IN] = x_ref[r + 1:r + L, :]   # tap l+1

    b1 = b_ref[:, OFF_B1:OFF_B1 + C1]
    h1 = jnp.dot(p1_ref[...].astype(bf16), w1_ref[...],
                 preferred_element_type=f32) + b1                        # (B*L, C1)
    h1_ref[...] = jnp.maximum(h1, 0.0)
    # MaxPool1d(2): max of even / odd conv-output rows (pairs stay within a batch)
    pooled1 = jnp.maximum(h1_ref[pl.ds(0, B * L2, stride=2), :],
                          h1_ref[pl.ds(1, B * L2, stride=2), :])         # (B*L2, C1)

    # ---------- conv2 ----------
    p2_ref[...] = jnp.zeros_like(p2_ref)
    p2_ref[:, C1:2 * C1] = pooled1
    for b in range(B):
        r = b * L2
        p2_ref[r + 1:r + L2, 0:C1] = pooled1[r:r + L2 - 1, :]            # tap l-1
        p2_ref[r:r + L2 - 1, 2 * C1:3 * C1] = pooled1[r + 1:r + L2, :]   # tap l+1

    b2 = b_ref[:, OFF_B2:OFF_B2 + C2]
    h2 = jnp.dot(p2_ref[...].astype(bf16), w2_ref[...],
                 preferred_element_type=f32) + b2                        # (B*L2, C2)
    h2_ref[...] = jnp.maximum(h2, 0.0)
    pooled2 = jnp.maximum(h2_ref[pl.ds(0, B * L4, stride=2), :],
                          h2_ref[pl.ds(1, B * L4, stride=2), :])         # (B*L4, C2)

    # ---------- flatten (position-major; PyTorch's channel-major order is folded
    # into fw1's row permutation at pack time) ----------
    for b in range(B):
        for l in range(L4):
            flat_ref[b:b + 1, l * C2:(l + 1) * C2] = \
                pooled2[b * L4 + l:b * L4 + l + 1, :]

    # ---------- MLP: fc1 + ReLU -> fc2 + ReLU -> fc3 ----------
    fb1 = b_ref[:, OFF_FB1:OFF_FB1 + F1]
    fb2 = b_ref[:, OFF_FB2:OFF_FB2 + F2]
    fb3 = b_ref[:, OFF_FB3:OFF_FB3 + F_OUT_PAD]
    h = jnp.dot(flat_ref[...].astype(bf16), fw1_ref[...],
                preferred_element_type=f32) + fb1
    h = jnp.maximum(h, 0.0).astype(bf16)
    h = jnp.dot(h, fw2_ref[...], preferred_element_type=f32) + fb2
    h = jnp.maximum(h, 0.0).astype(bf16)
    out_ref[...] = jnp.dot(h, fw3_ref[...], preferred_element_type=f32) + fb3


# ---------------- wrapper ----------------

def my_network_forward(x_ncl, kp):
    """x_ncl: (B, C_IN, L) float32 (PyTorch NCL). kp: packed kernel params."""
    assert x_ncl.shape == (B, C_IN, L), x_ncl.shape
    # tiny layout-only prep: channels-last rows, row index = b*L + l
    x2 = jnp.transpose(x_ncl, (0, 2, 1)).reshape(B * L, C_IN)
    out = pl.pallas_call(
        fused_forward_kernel,
        out_shape=jax.ShapeDtypeStruct((B, F_OUT_PAD), jnp.float32),
        in_specs=_vmem_specs(7),
        out_specs=pl.BlockSpec(memory_space=pltpu.MemorySpace.VMEM),
        scratch_shapes=[
            pltpu.VMEM((B * L, K * C_IN), jnp.float32),    # conv1 im2col patches
            pltpu.VMEM((B * L, C1), jnp.float32),          # conv1 pre-pool output
            pltpu.VMEM((B * L2, K * C1), jnp.float32),     # conv2 im2col patches
            pltpu.VMEM((B * L2, C2), jnp.float32),         # conv2 pre-pool output
            pltpu.VMEM((B, F_IN), jnp.float32),            # flattened MLP input
        ],
    )(x2, kp["w1"], kp["w2"], kp["fw1"], kp["fw2"], kp["fw3"], kp["bias"])
    return out[:, :F_OUT]


# ---------------- parameter init (reference layout, f32) ----------------

def init_params(key):
    ks = jax.random.split(key, 10)

    def init(k, fan_in, shape):
        return (jax.random.normal(k, shape, jnp.float32) / jnp.sqrt(fan_in)).astype(jnp.float32)

    return dict(
        w1=init(ks[0], K * C_IN, (K * C_IN, C1)),   # conv1 weight, im2col layout
        b1=init(ks[1], K * C_IN, (1, C1)),
        w2=init(ks[2], K * C1, (K * C1, C2)),       # conv2 weight, im2col layout
        b2=init(ks[3], K * C1, (1, C2)),
        fw1=init(ks[4], F_IN, (F_IN, F1)),          # rows in PyTorch channel-major order
        fb1=init(ks[5], F_IN, (1, F1)),
        fw2=init(ks[6], F1, (F1, F2)),
        fb2=init(ks[7], F1, (1, F2)),
        fw3=init(ks[8], F2, (F2, F_OUT)),
        fb3=init(ks[9], F2, (1, F_OUT)),
    )


def pack_params(params):
    """One-time repack into kernel layout: bf16 weights, fc1 row permutation that
    absorbs the channel-major flatten, fc3 columns padded to 128, biases packed."""
    idx = jnp.arange(F_IN)
    perm = (idx % C2) * L4 + (idx // C2)            # position-major row -> channel-major row
    fw1p = params["fw1"][perm, :]
    fw3p = jnp.zeros((F2, F_OUT_PAD), jnp.float32).at[:, :F_OUT].set(params["fw3"])
    bias = jnp.zeros((1, BIAS_W), jnp.float32)
    bias = bias.at[:, OFF_B1:OFF_B1 + C1].set(params["b1"])
    bias = bias.at[:, OFF_B2:OFF_B2 + C2].set(params["b2"])
    bias = bias.at[:, OFF_FB1:OFF_FB1 + F1].set(params["fb1"])
    bias = bias.at[:, OFF_FB2:OFF_FB2 + F2].set(params["fb2"])
    bias = bias.at[:, OFF_FB3:OFF_FB3 + F_OUT].set(params["fb3"])
    return dict(
        w1=params["w1"].astype(jnp.bfloat16),
        w2=params["w2"].astype(jnp.bfloat16),
        fw1=fw1p.astype(jnp.bfloat16),
        fw2=params["fw2"].astype(jnp.bfloat16),
        fw3=fw3p.astype(jnp.bfloat16),
        bias=bias,
    )


# ---------------- pure-JAX reference (module semantics, matched bf16/f32 numerics) --

def reference_forward(x_ncl, params):
    bf16, f32 = jnp.bfloat16, jnp.float32
    x = jnp.transpose(x_ncl, (0, 2, 1))                        # (B, L, C_IN)

    def conv_relu_pool_ref(h, w, b):
        bsz, l, _ = h.shape
        wk = w.reshape(K, -1, w.shape[1]).astype(bf16)         # (K, Cin, Cout) HIO
        y = jax.lax.conv_general_dilated(
            h.astype(bf16), wk, window_strides=(1,), padding=((1, 1),),
            dimension_numbers=("NHC", "HIO", "NHC"),
            preferred_element_type=f32)
        y = jnp.maximum(y + b.reshape(1, 1, -1), 0.0)
        return y.reshape(bsz, l // 2, 2, -1).max(axis=2)

    h = conv_relu_pool_ref(x, params["w1"], params["b1"])      # (B, 24, 18)
    h = conv_relu_pool_ref(h, params["w2"], params["b2"])      # (B, 12, 36)
    # PyTorch x.view(B, -1) on an NCL tensor: channel-major flatten.
    h = jnp.transpose(h, (0, 2, 1)).reshape(x.shape[0], -1)
    h = jnp.maximum(jnp.dot(h.astype(bf16), params["fw1"].astype(bf16),
                            preferred_element_type=f32) + params["fb1"], 0.0)
    h = jnp.maximum(jnp.dot(h.astype(bf16), params["fw2"].astype(bf16),
                            preferred_element_type=f32) + params["fb2"], 0.0)
    return jnp.dot(h.astype(bf16), params["fw3"].astype(bf16),
                   preferred_element_type=f32) + params["fb3"]


if __name__ == "__main__":
    key = jax.random.PRNGKey(0)
    pkey, xkey = jax.random.split(key)
    params = init_params(pkey)
    kparams = pack_params(params)                              # one-time repack (outside jit)
    x = jax.random.normal(xkey, (B, C_IN, L), jnp.float32)     # (2, 6, 48) NCL like PyTorch

    fwd = jax.jit(my_network_forward)
    out = jax.block_until_ready(fwd(x, kparams))
    assert out.shape == (B, F_OUT), out.shape

    ref = reference_forward(x, params)
    err = float(jnp.max(jnp.abs(out - ref)))
    if not bool(jnp.allclose(out, ref, atol=2e-2, rtol=2e-2)):
        raise AssertionError(f"Pallas output mismatch vs reference, max abs err={err}")

    print("KERNEL_OK")
</pallas_src>

<mosaic_0001>
module attributes {stable_mosaic.version = 11 : i64} {
  func.func @fused_forward_kernel(%arg0: memref<96x6xf32, #tpu.memory_space<vmem>>, %arg1: memref<18x18xbf16, #tpu.memory_space<vmem>>, %arg2: memref<54x36xbf16, #tpu.memory_space<vmem>>, %arg3: memref<432x512xbf16, #tpu.memory_space<vmem>>, %arg4: memref<512x128xbf16, #tpu.memory_space<vmem>>, %arg5: memref<128x128xbf16, #tpu.memory_space<vmem>>, %arg6: memref<1x1024xf32, #tpu.memory_space<vmem>>, %arg7: memref<2x128xf32, #tpu.memory_space<vmem>>, %arg8: memref<96x18xf32, #tpu.memory_space<vmem>>, %arg9: memref<96x18xf32, #tpu.memory_space<vmem>>, %arg10: memref<48x54xf32, #tpu.memory_space<vmem>>, %arg11: memref<48x36xf32, #tpu.memory_space<vmem>>, %arg12: memref<2x432xf32, #tpu.memory_space<vmem>>) attributes {dimension_semantics = [], scalar_prefetch = 0 : i64, scratch_operands = 5 : i64, tpu.core_type = #tpu.core_type<tc>} {
    %cst = arith.constant 0.000000e+00 : f32
    %0 = vector.broadcast %cst : f32 to vector<96x18xf32>
    %c0 = arith.constant 0 : index
    %c0_0 = arith.constant 0 : index
    %1 = vector.load %arg8[%c0, %c0_0] : memref<96x18xf32, #tpu.memory_space<vmem>>, vector<96x18xf32>
    tpu.vector_store %arg8[%c0, %c0_0], %0 {strides = array<i32>} : memref<96x18xf32, #tpu.memory_space<vmem>>, vector<96x18xf32>,
    %c0_1 = arith.constant 0 : index
    %c0_2 = arith.constant 0 : index
    %2 = vector.load %arg0[%c0_1, %c0_2] : memref<96x6xf32, #tpu.memory_space<vmem>>, vector<96x6xf32>
    %c0_3 = arith.constant 0 : index
    %c6 = arith.constant 6 : index
    %3 = vector.load %arg8[%c0_3, %c6] : memref<96x18xf32, #tpu.memory_space<vmem>>, vector<96x6xf32>
    tpu.vector_store %arg8[%c0_3, %c6], %2 {strides = array<i32>} : memref<96x18xf32, #tpu.memory_space<vmem>>, vector<96x6xf32>,
    %c0_4 = arith.constant 0 : index
    %c0_5 = arith.constant 0 : index
    %4 = vector.load %arg0[%c0_4, %c0_5] : memref<96x6xf32, #tpu.memory_space<vmem>>, vector<47x6xf32>
    %c1 = arith.constant 1 : index
    %c0_6 = arith.constant 0 : index
    %5 = vector.load %arg8[%c1, %c0_6] : memref<96x18xf32, #tpu.memory_space<vmem>>, vector<47x6xf32>
    tpu.vector_store %arg8[%c1, %c0_6], %4 {strides = array<i32>} : memref<96x18xf32, #tpu.memory_space<vmem>>, vector<47x6xf32>,
    %c1_7 = arith.constant 1 : index
    %c0_8 = arith.constant 0 : index
    %6 = vector.load %arg0[%c1_7, %c0_8] : memref<96x6xf32, #tpu.memory_space<vmem>>, vector<47x6xf32>
    %c0_9 = arith.constant 0 : index
    %c12 = arith.constant 12 : index
    %7 = vector.load %arg8[%c0_9, %c12] : memref<96x18xf32, #tpu.memory_space<vmem>>, vector<47x6xf32>
    tpu.vector_store %arg8[%c0_9, %c12], %6 {strides = array<i32>} : memref<96x18xf32, #tpu.memory_space<vmem>>, vector<47x6xf32>,
    %c48 = arith.constant 48 : index
    %c0_10 = arith.constant 0 : index
    %8 = vector.load %arg0[%c48, %c0_10] : memref<96x6xf32, #tpu.memory_space<vmem>>, vector<47x6xf32>
    %c49 = arith.constant 49 : index
    %c0_11 = arith.constant 0 : index
    %9 = vector.load %arg8[%c49, %c0_11] : memref<96x18xf32, #tpu.memory_space<vmem>>, vector<47x6xf32>
    tpu.vector_store %arg8[%c49, %c0_11], %8 {strides = array<i32>} : memref<96x18xf32, #tpu.memory_space<vmem>>, vector<47x6xf32>,
    %c49_12 = arith.constant 49 : index
    %c0_13 = arith.constant 0 : index
    %10 = vector.load %arg0[%c49_12, %c0_13] : memref<96x6xf32, #tpu.memory_space<vmem>>, vector<47x6xf32>
    %c48_14 = arith.constant 48 : index
    %c12_15 = arith.constant 12 : index
    %11 = vector.load %arg8[%c48_14, %c12_15] : memref<96x18xf32, #tpu.memory_space<vmem>>, vector<47x6xf32>
    tpu.vector_store %arg8[%c48_14, %c12_15], %10 {strides = array<i32>} : memref<96x18xf32, #tpu.memory_space<vmem>>, vector<47x6xf32>,
    %c0_16 = arith.constant 0 : index
    %c0_17 = arith.constant 0 : index
    %12 = vector.load %arg6[%c0_16, %c0_17] : memref<1x1024xf32, #tpu.memory_space<vmem>>, vector<1x18xf32>
    %c0_18 = arith.constant 0 : index
    %c0_19 = arith.constant 0 : index
    %13 = vector.load %arg8[%c0_18, %c0_19] : memref<96x18xf32, #tpu.memory_space<vmem>>, vector<96x18xf32>
    %14 = arith.truncf %13 : vector<96x18xf32> to vector<96x18xbf16>
    %c0_20 = arith.constant 0 : index
    %c0_21 = arith.constant 0 : index
    %15 = vector.load %arg1[%c0_20, %c0_21] : memref<18x18xbf16, #tpu.memory_space<vmem>>, vector<18x18xbf16>
    %cst_22 = arith.constant dense<0.000000e+00> : vector<96x18xf32>
    %16 = tpu.matmul %14, %15, %cst_22 {dimension_numbers = #tpu.dot_dimension_numbers<[1], [0], [0], [1], [0, 0, 1, 1], [], []>} : vector<96x18xbf16>, vector<18x18xbf16>, vector<96x18xf32> -> vector<96x18xf32>
    %17 = vector.broadcast %12 : vector<1x18xf32> to vector<96x18xf32>
    %18 = arith.addf %16, %17 : vector<96x18xf32>
    %cst_23 = arith.constant 0.000000e+00 : f32
    %19 = vector.broadcast %cst_23 : f32 to vector<96x18xf32>
    %20 = arith.maximumf %18, %19 : vector<96x18xf32>
    %c0_24 = arith.constant 0 : index
    %c0_25 = arith.constant 0 : index
    %21 = vector.load %arg9[%c0_24, %c0_25] : memref<96x18xf32, #tpu.memory_space<vmem>>, vector<96x18xf32>
    tpu.vector_store %arg9[%c0_24, %c0_25], %20 {strides = array<i32>} : memref<96x18xf32, #tpu.memory_space<vmem>>, vector<96x18xf32>,
    %c0_26 = arith.constant 0 : index
    %c0_27 = arith.constant 0 : index
    %22 = tpu.strided_load %arg9[%c0_26, %c0_27] {strides = array<i32: 2, 1>} : memref<96x18xf32, #tpu.memory_space<vmem>>, vector<48x18xf32>
    %c1_28 = arith.constant 1 : index
    %c0_29 = arith.constant 0 : index
    %23 = tpu.strided_load %arg9[%c1_28, %c0_29] {strides = array<i32: 2, 1>} : memref<96x18xf32, #tpu.memory_space<vmem>>, vector<48x18xf32>
    %24 = arith.maximumf %22, %23 : vector<48x18xf32>
    %cst_30 = arith.constant 0.000000e+00 : f32
    %25 = vector.broadcast %cst_30 : f32 to vector<48x54xf32>
    %c0_31 = arith.constant 0 : index
    %c0_32 = arith.constant 0 : index
    %26 = vector.load %arg10[%c0_31, %c0_32] : memref<48x54xf32, #tpu.memory_space<vmem>>, vector<48x54xf32>
    tpu.vector_store %arg10[%c0_31, %c0_32], %25 {strides = array<i32>} : memref<48x54xf32, #tpu.memory_space<vmem>>, vector<48x54xf32>,
    %c0_33 = arith.constant 0 : index
    %c18 = arith.constant 18 : index
    %27 = vector.load %arg10[%c0_33, %c18] : memref<48x54xf32, #tpu.memory_space<vmem>>, vector<48x18xf32>
    tpu.vector_store %arg10[%c0_33, %c18], %24 {strides = array<i32>} : memref<48x54xf32, #tpu.memory_space<vmem>>, vector<48x18xf32>,
    %28 = vector.extract_strided_slice %24 {offsets = [0, 0], sizes = [23, 18], strides = [1, 1]} : vector<48x18xf32> to vector<23x18xf32>
    %c1_34 = arith.constant 1 : index
    %c0_35 = arith.constant 0 : index
    %29 = vector.load %arg10[%c1_34, %c0_35] : memref<48x54xf32, #tpu.memory_space<vmem>>, vector<23x18xf32>
    tpu.vector_store %arg10[%c1_34, %c0_35], %28 {strides = array<i32>} : memref<48x54xf32, #tpu.memory_space<vmem>>, vector<23x18xf32>,
    %30 = vector.extract_strided_slice %24 {offsets = [1, 0], sizes = [23, 18], strides = [1, 1]} : vector<48x18xf32> to vector<23x18xf32>
    %c0_36 = arith.constant 0 : index
    %c36 = arith.constant 36 : index
    %31 = vector.load %arg10[%c0_36, %c36] : memref<48x54xf32, #tpu.memory_space<vmem>>, vector<23x18xf32>
    tpu.vector_store %arg10[%c0_36, %c36], %30 {strides = array<i32>} : memref<48x54xf32, #tpu.memory_space<vmem>>, vector<23x18xf32>,
    %32 = vector.extract_strided_slice %24 {offsets = [24, 0], sizes = [23, 18], strides = [1, 1]} : vector<48x18xf32> to vector<23x18xf32>
    %c25 = arith.constant 25 : index
    %c0_37 = arith.constant 0 : index
    %33 = vector.load %arg10[%c25, %c0_37] : memref<48x54xf32, #tpu.memory_space<vmem>>, vector<23x18xf32>
    tpu.vector_store %arg10[%c25, %c0_37], %32 {strides = array<i32>} : memref<48x54xf32, #tpu.memory_space<vmem>>, vector<23x18xf32>,
    %34 = vector.extract_strided_slice %24 {offsets = [25, 0], sizes = [23, 18], strides = [1, 1]} : vector<48x18xf32> to vector<23x18xf32>
    %c24 = arith.constant 24 : index
    %c36_38 = arith.constant 36 : index
    %35 = vector.load %arg10[%c24, %c36_38] : memref<48x54xf32, #tpu.memory_space<vmem>>, vector<23x18xf32>
    tpu.vector_store %arg10[%c24, %c36_38], %34 {strides = array<i32>} : memref<48x54xf32, #tpu.memory_space<vmem>>, vector<23x18xf32>,
    %c0_39 = arith.constant 0 : index
    %c128 = arith.constant 128 : index
    %36 = vector.load %arg6[%c0_39, %c128] : memref<1x1024xf32, #tpu.memory_space<vmem>>, vector<1x36xf32>
    %c0_40 = arith.constant 0 : index
    %c0_41 = arith.constant 0 : index
    %37 = vector.load %arg10[%c0_40, %c0_41] : memref<48x54xf32, #tpu.memory_space<vmem>>, vector<48x54xf32>
    %38 = arith.truncf %37 : vector<48x54xf32> to vector<48x54xbf16>
    %c0_42 = arith.constant 0 : index
    %c0_43 = arith.constant 0 : index
    %39 = vector.load %arg2[%c0_42, %c0_43] : memref<54x36xbf16, #tpu.memory_space<vmem>>, vector<54x36xbf16>
    %cst_44 = arith.constant dense<0.000000e+00> : vector<48x36xf32>
    %40 = tpu.matmul %38, %39, %cst_44 {dimension_numbers = #tpu.dot_dimension_numbers<[1], [0], [0], [1], [0, 0, 1, 1], [], []>} : vector<48x54xbf16>, vector<54x36xbf16>, vector<48x36xf32> -> vector<48x36xf32>
    %41 = vector.broadcast %36 : vector<1x36xf32> to vector<48x36xf32>
    %42 = arith.addf %40, %41 : vector<48x36xf32>
    %cst_45 = arith.constant 0.000000e+00 : f32
    %43 = vector.broadcast %cst_45 : f32 to vector<48x36xf32>
    %44 = arith.maximumf %42, %43 : vector<48x36xf32>
    %c0_46 = arith.constant 0 : index
    %c0_47 = arith.constant 0 : index
    %45 = vector.load %arg11[%c0_46, %c0_47] : memref<48x36xf32, #tpu.memory_space<vmem>>, vector<48x36xf32>
    tpu.vector_store %arg11[%c0_46, %c0_47], %44 {strides = array<i32>} : memref<48x36xf32, #tpu.memory_space<vmem>>, vector<48x36xf32>,
    %c0_48 = arith.constant 0 : index
    %c0_49 = arith.constant 0 : index
    %46 = tpu.strided_load %arg11[%c0_48, %c0_49] {strides = array<i32: 2, 1>} : memref<48x36xf32, #tpu.memory_space<vmem>>, vector<24x36xf32>
    %c1_50 = arith.constant 1 : index
    %c0_51 = arith.constant 0 : index
    %47 = tpu.strided_load %arg11[%c1_50, %c0_51] {strides = array<i32: 2, 1>} : memref<48x36xf32, #tpu.memory_space<vmem>>, vector<24x36xf32>
    %48 = arith.maximumf %46, %47 : vector<24x36xf32>
    %49 = vector.extract_strided_slice %48 {offsets = [0, 0], sizes = [1, 36], strides = [1, 1]} : vector<24x36xf32> to vector<1x36xf32>
    %c0_52 = arith.constant 0 : index
    %c0_53 = arith.constant 0 : index
    %50 = vector.load %arg12[%c0_52, %c0_53] : memref<2x432xf32, #tpu.memory_space<vmem>>, vector<1x36xf32>
    tpu.vector_store %arg12[%c0_52, %c0_53], %49 {strides = array<i32>} : memref<2x432xf32, #tpu.memory_space<vmem>>, vector<1x36xf32>,
    %51 = vector.extract_strided_slice %48 {offsets = [1, 0], sizes = [1, 36], strides = [1, 1]} : vector<24x36xf32> to vector<1x36xf32>
    %c0_54 = arith.constant 0 : index
    %c36_55 = arith.constant 36 : index
    %52 = vector.load %arg12[%c0_54, %c36_55] : memref<2x432xf32, #tpu.memory_space<vmem>>, vector<1x36xf32>
    tpu.vector_store %arg12[%c0_54, %c36_55], %51 {strides = array<i32>} : memref<2x432xf32, #tpu.memory_space<vmem>>, vector<1x36xf32>,
    %53 = vector.extract_strided_slice %48 {offsets = [2, 0], sizes = [1, 36], strides = [1, 1]} : vector<24x36xf32> to vector<1x36xf32>
    %c0_56 = arith.constant 0 : index
    %c72 = arith.constant 72 : index
    %54 = vector.load %arg12[%c0_56, %c72] : memref<2x432xf32, #tpu.memory_space<vmem>>, vector<1x36xf32>
    tpu.vector_store %arg12[%c0_56, %c72], %53 {strides = array<i32>} : memref<2x432xf32, #tpu.memory_space<vmem>>, vector<1x36xf32>,
    %55 = vector.extract_strided_slice %48 {offsets = [3, 0], sizes = [1, 36], strides = [1, 1]} : vector<24x36xf32> to vector<1x36xf32>
    %c0_57 = arith.constant 0 : index
    %c108 = arith.constant 108 : index
    %56 = vector.load %arg12[%c0_57, %c108] : memref<2x432xf32, #tpu.memory_space<vmem>>, vector<1x36xf32>
    tpu.vector_store %arg12[%c0_57, %c108], %55 {strides = array<i32>} : memref<2x432xf32, #tpu.memory_space<vmem>>, vector<1x36xf32>,
    %57 = vector.extract_strided_slice %48 {offsets = [4, 0], sizes = [1, 36], strides = [1, 1]} : vector<24x36xf32> to vector<1x36xf32>
    %c0_58 = arith.constant 0 : index
    %c144 = arith.constant 144 : index
    %58 = vector.load %arg12[%c0_58, %c144] : memref<2x432xf32, #tpu.memory_space<vmem>>, vector<1x36xf32>
    tpu.vector_store %arg12[%c0_58, %c144], %57 {strides = array<i32>} : memref<2x432xf32, #tpu.memory_space<vmem>>, vector<1x36xf32>,
    %59 = vector.extract_strided_slice %48 {offsets = [5, 0], sizes = [1, 36], strides = [1, 1]} : vector<24x36xf32> to vector<1x36xf32>
    %c0_59 = arith.constant 0 : index
    %c180 = arith.constant 180 : index
    %60 = vector.load %arg12[%c0_59, %c180] : memref<2x432xf32, #tpu.memory_space<vmem>>, vector<1x36xf32>
    tpu.vector_store %arg12[%c0_59, %c180], %59 {strides = array<i32>} : memref<2x432xf32, #tpu.memory_space<vmem>>, vector<1x36xf32>,
    %61 = vector.extract_strided_slice %48 {offsets = [6, 0], sizes = [1, 36], strides = [1, 1]} : vector<24x36xf32> to vector<1x36xf32>
    %c0_60 = arith.constant 0 : index
    %c216 = arith.constant 216 : index
    %62 = vector.load %arg12[%c0_60, %c216] : memref<2x432xf32, #tpu.memory_space<vmem>>, vector<1x36xf32>
    tpu.vector_store %arg12[%c0_60, %c216], %61 {strides = array<i32>} : memref<2x432xf32, #tpu.memory_space<vmem>>, vector<1x36xf32>,
    %63 = vector.extract_strided_slice %48 {offsets = [7, 0], sizes = [1, 36], strides = [1, 1]} : vector<24x36xf32> to vector<1x36xf32>
    %c0_61 = arith.constant 0 : index
    %c252 = arith.constant 252 : index
    %64 = vector.load %arg12[%c0_61, %c252] : memref<2x432xf32, #tpu.memory_space<vmem>>, vector<1x36xf32>
    tpu.vector_store %arg12[%c0_61, %c252], %63 {strides = array<i32>} : memref<2x432xf32, #tpu.memory_space<vmem>>, vector<1x36xf32>,
    %65 = vector.extract_strided_slice %48 {offsets = [8, 0], sizes = [1, 36], strides = [1, 1]} : vector<24x36xf32> to vector<1x36xf32>
    %c0_62 = arith.constant 0 : index
    %c288 = arith.constant 288 : index
    %66 = vector.load %arg12[%c0_62, %c288] : memref<2x432xf32, #tpu.memory_space<vmem>>, vector<1x36xf32>
    tpu.vector_store %arg12[%c0_62, %c288], %65 {strides = array<i32>} : memref<2x432xf32, #tpu.memory_space<vmem>>, vector<1x36xf32>,
    %67 = vector.extract_strided_slice %48 {offsets = [9, 0], sizes = [1, 36], strides = [1, 1]} : vector<24x36xf32> to vector<1x36xf32>
    %c0_63 = arith.constant 0 : index
    %c324 = arith.constant 324 : index
    %68 = vector.load %arg12[%c0_63, %c324] : memref<2x432xf32, #tpu.memory_space<vmem>>, vector<1x36xf32>
    tpu.vector_store %arg12[%c0_63, %c324], %67 {strides = array<i32>} : memref<2x432xf32, #tpu.memory_space<vmem>>, vector<1x36xf32>,
    %69 = vector.extract_strided_slice %48 {offsets = [10, 0], sizes = [1, 36], strides = [1, 1]} : vector<24x36xf32> to vector<1x36xf32>
    %c0_64 = arith.constant 0 : index
    %c360 = arith.constant 360 : index
    %70 = vector.load %arg12[%c0_64, %c360] : memref<2x432xf32, #tpu.memory_space<vmem>>, vector<1x36xf32>
    tpu.vector_store %arg12[%c0_64, %c360], %69 {strides = array<i32>} : memref<2x432xf32, #tpu.memory_space<vmem>>, vector<1x36xf32>,
    %71 = vector.extract_strided_slice %48 {offsets = [11, 0], sizes = [1, 36], strides = [1, 1]} : vector<24x36xf32> to vector<1x36xf32>
    %c0_65 = arith.constant 0 : index
    %c396 = arith.constant 396 : index
    %72 = vector.load %arg12[%c0_65, %c396] : memref<2x432xf32, #tpu.memory_space<vmem>>, vector<1x36xf32>
    tpu.vector_store %arg12[%c0_65, %c396], %71 {strides = array<i32>} : memref<2x432xf32, #tpu.memory_space<vmem>>, vector<1x36xf32>,
    %73 = vector.extract_strided_slice %48 {offsets = [12, 0], sizes = [1, 36], strides = [1, 1]} : vector<24x36xf32> to vector<1x36xf32>
    %c1_66 = arith.constant 1 : index
    %c0_67 = arith.constant 0 : index
    %74 = vector.load %arg12[%c1_66, %c0_67] : memref<2x432xf32, #tpu.memory_space<vmem>>, vector<1x36xf32>
    tpu.vector_store %arg12[%c1_66, %c0_67], %73 {strides = array<i32>} : memref<2x432xf32, #tpu.memory_space<vmem>>, vector<1x36xf32>,
    %75 = vector.extract_strided_slice %48 {offsets = [13, 0], sizes = [1, 36], strides = [1, 1]} : vector<24x36xf32> to vector<1x36xf32>
    %c1_68 = arith.constant 1 : index
    %c36_69 = arith.constant 36 : index
    %76 = vector.load %arg12[%c1_68, %c36_69] : memref<2x432xf32, #tpu.memory_space<vmem>>, vector<1x36xf32>
    tpu.vector_store %arg12[%c1_68, %c36_69], %75 {strides = array<i32>} : memref<2x432xf32, #tpu.memory_space<vmem>>, vector<1x36xf32>,
    %77 = vector.extract_strided_slice %48 {offsets = [14, 0], sizes = [1, 36], strides = [1, 1]} : vector<24x36xf32> to vector<1x36xf32>
    %c1_70 = arith.constant 1 : index
    %c72_71 = arith.constant 72 : index
    %78 = vector.load %arg12[%c1_70, %c72_71] : memref<2x432xf32, #tpu.memory_space<vmem>>, vector<1x36xf32>
    tpu.vector_store %arg12[%c1_70, %c72_71], %77 {strides = array<i32>} : memref<2x432xf32, #tpu.memory_space<vmem>>, vector<1x36xf32>,
    %79 = vector.extract_strided_slice %48 {offsets = [15, 0], sizes = [1, 36], strides = [1, 1]} : vector<24x36xf32> to vector<1x36xf32>
    %c1_72 = arith.constant 1 : index
    %c108_73 = arith.constant 108 : index
    %80 = vector.load %arg12[%c1_72, %c108_73] : memref<2x432xf32, #tpu.memory_space<vmem>>, vector<1x36xf32>
    tpu.vector_store %arg12[%c1_72, %c108_73], %79 {strides = array<i32>} : memref<2x432xf32, #tpu.memory_space<vmem>>, vector<1x36xf32>,
    %81 = vector.extract_strided_slice %48 {offsets = [16, 0], sizes = [1, 36], strides = [1, 1]} : vector<24x36xf32> to vector<1x36xf32>
    %c1_74 = arith.constant 1 : index
    %c144_75 = arith.constant 144 : index
    %82 = vector.load %arg12[%c1_74, %c144_75] : memref<2x432xf32, #tpu.memory_space<vmem>>, vector<1x36xf32>
    tpu.vector_store %arg12[%c1_74, %c144_75], %81 {strides = array<i32>} : memref<2x432xf32, #tpu.memory_space<vmem>>, vector<1x36xf32>,
    %83 = vector.extract_strided_slice %48 {offsets = [17, 0], sizes = [1, 36], strides = [1, 1]} : vector<24x36xf32> to vector<1x36xf32>
    %c1_76 = arith.constant 1 : index
    %c180_77 = arith.constant 180 : index
    %84 = vector.load %arg12[%c1_76, %c180_77] : memref<2x432xf32, #tpu.memory_space<vmem>>, vector<1x36xf32>
    tpu.vector_store %arg12[%c1_76, %c180_77], %83 {strides = array<i32>} : memref<2x432xf32, #tpu.memory_space<vmem>>, vector<1x36xf32>,
    %85 = vector.extract_strided_slice %48 {offsets = [18, 0], sizes = [1, 36], strides = [1, 1]} : vector<24x36xf32> to vector<1x36xf32>
    %c1_78 = arith.constant 1 : index
    %c216_79 = arith.constant 216 : index
    %86 = vector.load %arg12[%c1_78, %c216_79] : memref<2x432xf32, #tpu.memory_space<vmem>>, vector<1x36xf32>
    tpu.vector_store %arg12[%c1_78, %c216_79], %85 {strides = array<i32>} : memref<2x432xf32, #tpu.memory_space<vmem>>, vector<1x36xf32>,
    %87 = vector.extract_strided_slice %48 {offsets = [19, 0], sizes = [1, 36], strides = [1, 1]} : vector<24x36xf32> to vector<1x36xf32>
    %c1_80 = arith.constant 1 : index
    %c252_81 = arith.constant 252 : index
    %88 = vector.load %arg12[%c1_80, %c252_81] : memref<2x432xf32, #tpu.memory_space<vmem>>, vector<1x36xf32>
    tpu.vector_store %arg12[%c1_80, %c252_81], %87 {strides = array<i32>} : memref<2x432xf32, #tpu.memory_space<vmem>>, vector<1x36xf32>,
    %89 = vector.extract_strided_slice %48 {offsets = [20, 0], sizes = [1, 36], strides = [1, 1]} : vector<24x36xf32> to vector<1x36xf32>
    %c1_82 = arith.constant 1 : index
    %c288_83 = arith.constant 288 : index
    %90 = vector.load %arg12[%c1_82, %c288_83] : memref<2x432xf32, #tpu.memory_space<vmem>>, vector<1x36xf32>
    tpu.vector_store %arg12[%c1_82, %c288_83], %89 {strides = array<i32>} : memref<2x432xf32, #tpu.memory_space<vmem>>, vector<1x36xf32>,
    %91 = vector.extract_strided_slice %48 {offsets = [21, 0], sizes = [1, 36], strides = [1, 1]} : vector<24x36xf32> to vector<1x36xf32>
    %c1_84 = arith.constant 1 : index
    %c324_85 = arith.constant 324 : index
    %92 = vector.load %arg12[%c1_84, %c324_85] : memref<2x432xf32, #tpu.memory_space<vmem>>, vector<1x36xf32>
    tpu.vector_store %arg12[%c1_84, %c324_85], %91 {strides = array<i32>} : memref<2x432xf32, #tpu.memory_space<vmem>>, vector<1x36xf32>,
    %93 = vector.extract_strided_slice %48 {offsets = [22, 0], sizes = [1, 36], strides = [1, 1]} : vector<24x36xf32> to vector<1x36xf32>
    %c1_86 = arith.constant 1 : index
    %c360_87 = arith.constant 360 : index
    %94 = vector.load %arg12[%c1_86, %c360_87] : memref<2x432xf32, #tpu.memory_space<vmem>>, vector<1x36xf32>
    tpu.vector_store %arg12[%c1_86, %c360_87], %93 {strides = array<i32>} : memref<2x432xf32, #tpu.memory_space<vmem>>, vector<1x36xf32>,
    %95 = vector.extract_strided_slice %48 {offsets = [23, 0], sizes = [1, 36], strides = [1, 1]} : vector<24x36xf32> to vector<1x36xf32>
    %c1_88 = arith.constant 1 : index
    %c396_89 = arith.constant 396 : index
    %96 = vector.load %arg12[%c1_88, %c396_89] : memref<2x432xf32, #tpu.memory_space<vmem>>, vector<1x36xf32>
    tpu.vector_store %arg12[%c1_88, %c396_89], %95 {strides = array<i32>} : memref<2x432xf32, #tpu.memory_space<vmem>>, vector<1x36xf32>,
    %c0_90 = arith.constant 0 : index
    %c256 = arith.constant 256 : index
    %97 = vector.load %arg6[%c0_90, %c256] : memref<1x1024xf32, #tpu.memory_space<vmem>>, vector<1x512xf32>
    %c0_91 = arith.constant 0 : index
    %c768 = arith.constant 768 : index
    %98 = vector.load %arg6[%c0_91, %c768] : memref<1x1024xf32, #tpu.memory_space<vmem>>, vector<1x128xf32>
    %c0_92 = arith.constant 0 : index
    %c896 = arith.constant 896 : index
    %99 = vector.load %arg6[%c0_92, %c896] : memref<1x1024xf32, #tpu.memory_space<vmem>>, vector<1x128xf32>
    %c0_93 = arith.constant 0 : index
    %c0_94 = arith.constant 0 : index
    %100 = vector.load %arg12[%c0_93, %c0_94] : memref<2x432xf32, #tpu.memory_space<vmem>>, vector<2x432xf32>
    %101 = arith.truncf %100 : vector<2x432xf32> to vector<2x432xbf16>
    %c0_95 = arith.constant 0 : index
    %c0_96 = arith.constant 0 : index
    %102 = vector.load %arg3[%c0_95, %c0_96] : memref<432x512xbf16, #tpu.memory_space<vmem>>, vector<432x512xbf16>
    %cst_97 = arith.constant dense<0.000000e+00> : vector<2x512xf32>
    %103 = tpu.matmul %101, %102, %cst_97 {dimension_numbers = #tpu.dot_dimension_numbers<[1], [0], [0], [1], [0, 0, 1, 1], [], []>} : vector<2x432xbf16>, vector<432x512xbf16>, vector<2x512xf32> -> vector<2x512xf32>
    %104 = vector.broadcast %97 : vector<1x512xf32> to vector<2x512xf32>
    %105 = arith.addf %103, %104 : vector<2x512xf32>
    %cst_98 = arith.constant 0.000000e+00 : f32
    %106 = vector.broadcast %cst_98 : f32 to vector<2x512xf32>
    %107 = arith.maximumf %105, %106 : vector<2x512xf32>
    %108 = arith.truncf %107 : vector<2x512xf32> to vector<2x512xbf16>
    %c0_99 = arith.constant 0 : index
    %c0_100 = arith.constant 0 : index
    %109 = vector.load %arg4[%c0_99, %c0_100] : memref<512x128xbf16, #tpu.memory_space<vmem>>, vector<512x128xbf16>
    %cst_101 = arith.constant dense<0.000000e+00> : vector<2x128xf32>
    %110 = tpu.matmul %108, %109, %cst_101 {dimension_numbers = #tpu.dot_dimension_numbers<[1], [0], [0], [1], [0, 0, 1, 1], [], []>} : vector<2x512xbf16>, vector<512x128xbf16>, vector<2x128xf32> -> vector<2x128xf32>
    %111 = vector.broadcast %98 : vector<1x128xf32> to vector<2x128xf32>
    %112 = arith.addf %110, %111 : vector<2x128xf32>
    %cst_102 = arith.constant 0.000000e+00 : f32
    %113 = vector.broadcast %cst_102 : f32 to vector<2x128xf32>
    %114 = arith.maximumf %112, %113 : vector<2x128xf32>
    %115 = arith.truncf %114 : vector<2x128xf32> to vector<2x128xbf16>
    %c0_103 = arith.constant 0 : index
    %c0_104 = arith.constant 0 : index
    %116 = vector.load %arg5[%c0_103, %c0_104] : memref<128x128xbf16, #tpu.memory_space<vmem>>, vector<128x128xbf16>
    %cst_105 = arith.constant dense<0.000000e+00> : vector<2x128xf32>
    %117 = tpu.matmul %115, %116, %cst_105 {dimension_numbers = #tpu.dot_dimension_numbers<[1], [0], [0], [1], [0, 0, 1, 1], [], []>} : vector<2x128xbf16>, vector<128x128xbf16>, vector<2x128xf32> -> vector<2x128xf32>
    %118 = vector.broadcast %99 : vector<1x128xf32> to vector<2x128xf32>
    %119 = arith.addf %117, %118 : vector<2x128xf32>
    %c0_106 = arith.constant 0 : index
    %c0_107 = arith.constant 0 : index
    %120 = vector.load %arg7[%c0_106, %c0_107] : memref<2x128xf32, #tpu.memory_space<vmem>>, vector<2x128xf32>
    tpu.vector_store %arg7[%c0_106, %c0_107], %119 {strides = array<i32>} : memref<2x128xf32, #tpu.memory_space<vmem>>, vector<2x128xf32>,
    return
  }
}

</mosaic_0001>

<bundles_post_ra>
// kernel: my_network_forward.1
= control target key start
LH: loop header
LB: loop body
LE: loop exit
PB: predicated region body
PF: predicated region fallthrough
CT: control target
= control target key end

     0   :  { %12 = vsyncpa [#allocation8], 0  ;;  %s3520_s0 = inlined_call_operand.vmem [shape: f32[96,6], index: 0, kind: input, shape index: {}]   ;;  %s3521_s1 = inlined_call_operand.vmem [shape: bf16[18,18], index: 1, kind: input, shape index: {}]   ;;  %s3522_s2 = inlined_call_operand.vmem [shape: bf16[54,36], index: 2, kind: input, shape index: {}]   ;;  %s3523_s3 = inlined_call_operand.hbm [shape: bf16[432,512], index: 3, kind: input, shape index: {}]   ;;  %s3524_s4 = inlined_call_operand.hbm [shape: bf16[512,128], index: 4, kind: input, shape index: {}]   ;;  %s3525_s5 = inlined_call_operand.vmem [shape: bf16[128,128], index: 5, kind: input, shape index: {}]   ;;  %s3526_s6 = inlined_call_operand.vmem [shape: f32[1,1024], index: 6, kind: input, shape index: {}]   ;;  %s3527_s7 = inlined_call_operand.hbm [shape: f32[2,128], index: 7, kind: output, shape index: {}]  }
   0x1   :  { %13 = vsyncpa [#allocation11], 0 }
   0x2   :  { %14 = vsyncpa [#allocation9], 0  ;;  %s25_s26 = sshll.u32 %s3523_s3, 4  ;;  %s2969_s27 = smov [#allocation7]   ;;  %s26_s26 = int_to_ptr.hbm [resolvable:$true] %s25_s26 }
   0x3   :  { %s27_s28 = sshll.u32 %s2969_s27, 4  ;;  %s38_s8 = sshll.u32 %s3524_s4, 4  ;;  %s28_s28 = int_to_ptr.vmem [resolvable:$true] %s27_s28  ;;  %s39_s8 = int_to_ptr.hbm [resolvable:$true] %s38_s8 }
   0x4   :  { %s2970_s9 = smov 256   ;;  %s2971_s10 = smov 16  }
   0x5   :  { %33 = dma.hbm_to_vmem [thread:$0]  %s26_s26, 13824, %s28_s28, [#allocation8], %s2970_s9, %s2970_s9, %s2971_s10  }
   0x6   :  { %s2972_s11 = smov [#allocation10]   ;;  %s2973_s13 = smov 64  }
   0x7   :  { %s40_s12 = sshll.u32 %s2972_s11, 4  ;;  %s2974_s14 = smov 4   ;;  %s41_s12 = int_to_ptr.vmem [resolvable:$true] %s40_s12 }
   0x8   :  { %46 = dma.hbm_to_vmem [thread:$0]  %s39_s8, 4096, %s41_s12, [#allocation11], %s2973_s13, %s2973_s13, %s2974_s14  }
   0x9   :  { %2963 = dma.done.wait [#allocation8], 13824  }
   0xa   :  { %2964 = vsyncadd [#allocation8], 4294953472 }
   0xb   :  { %2965 = dma.done.wait [#allocation11], 4096  }
   0xc   :  { %2966 = vsyncadd [#allocation11], 4294963200  ;;  %v3039_v0 = vld [vmem:[%s3520_s0] sm:$0xff]  ;;  %v3044_v1 = vld [vmem:[%s3520_s0 + $0x10] sm:$0xff]  ;;  %s2975_s17 = smov 6   ;;  %s2976_s20 = smov 12  }
   0xd   :  { %97 = vrot.lane.b32.xlu0 %v3039_v0, %s2975_s17  ;;  %101 = vrot.lane.b32.xlu1 %v3044_v1, %s2975_s17  ;;  %v161_v2 = vld [vmem:[%s3520_s0 + $0x9] sm:$0xff]  ;;  %v160_v4 = vld [vmem:[%s3520_s0 + $0x1] sm:$0xff]  ;;  %vm60_vm0 = vcmask 146432   ;;  %v2977_v12 = vmov 0.0   ;;  %vm298_vm1 = vcmask 1040384   ;;  %vm133_vm2 = vcmask 97328  }
   0xe   :  { %174 = vrot.lane.b32.xlu2 %v161_v2, %s2976_s20  ;;  %v3057_v3 = vld [vmem:[%s3520_s0 + $0x8] sm:$0xff]  ;;  %v3065_v5 = vld [vmem:[%s3520_s0 + $0x18] sm:$0xff]  ;;  %v3075_v6 = vld [vmem:[%s3520_s0 + $0x20] sm:$0xff]  ;;  %61 = vst.msk [vmem:[#allocation2] sm:$0xff] %vm60_vm0, %v2977_v12  ;;  %vm152_vm3 = vcmask 48128   ;;  %vm190_vm4 = vcmask 146528  }
   0xf   :  { %v162_v7 = vld [vmem:[%s3520_s0 + $0x11] sm:$0xff]  ;;  %v163_v8 = vld [vmem:[%s3520_s0 + $0x19] sm:$0xff]  ;;  %v78_v9 = vld [vmem:[%s3520_s0 + $0x28] sm:$0xff]  ;;  %62 = vst.msk [vmem:[#allocation2 + $0x8] sm:$0xff] %vm60_vm0, %v2977_v12  ;;  %vm158_vm5 = vcmask 47104   ;;  %vm196_vm6 = vcmask 145504  }
  0x10   :  { %v164_v10 = vld [vmem:[%s3520_s0 + $0x21] sm:$0xff]  ;;  %v165_v11 = vld [vmem:[%s3520_s0 + $0x29] sm:$0x7f]  ;;  %v3106_v13 = vld [vmem:[%s3520_s0 + $0x38] sm:$0xff]  ;;  %63 = vst.msk [vmem:[#allocation2 + $0x10] sm:$0xff] %vm60_vm0, %v2977_v12  ;;  %s2978_s26 = smov 18  }
  0x11   :  { %v3111_v14 = vld [vmem:[%s3520_s0 + $0x30] sm:$0xff]  ;;  %64 = vst.msk [vmem:[#allocation2 + $0x18] sm:$0xff] %vm60_vm0, %v2977_v12  ;;  %v3120_v15 = vld [vmem:[%s3520_s0 + $0x40] sm:$0xff]  ;;  %v3153_v18 = vld [vmem:[%s3520_s0 + $0x48] sm:$0xff]  ;;  %s2979_s27 = smov 36   ;;  %vm394_vm7 = vcmask 441344  }
  0x12   :  { %65 = vst.msk [vmem:[#allocation2 + $0x20] sm:$0xff] %vm60_vm0, %v2977_v12  ;;  %v211_v16 = vld [vmem:[%s3520_s0 + $0x39] sm:$0xff]  ;;  %v210_v17 = vld [vmem:[%s3520_s0 + $0x31] sm:$0xff]  ;;  %v212_v20 = vld [vmem:[%s3520_s0 + $0x41] sm:$0xff]  ;;  %vm515_vm8 = vcmask 1042432   ;;  %vm425_vm9 = vcmask 294032  }
  0x13   :  { %66 = vst.msk [vmem:[#allocation2 + $0x28] sm:$0xff] %vm60_vm0, %v2977_v12  ;;  %v3162_v19 = vld [vmem:[%s3520_s0 + $0x50] sm:$0xff]  ;;  %v84_v22 = vld [vmem:[%s3520_s0 + $0x58] sm:$0xff]  ;;  %v267_v25 = vld [vmem:[%s3521_s1 + $0x8] sm:$0x1]  ;;  %vm434_vm10 = vcmask 145408  }
  0x14   :  { %67 = vst.msk [vmem:[#allocation2 + $0x30] sm:$0xff] %vm60_vm0, %v2977_v12  ;;  %v213_v21 = vld [vmem:[%s3520_s0 + $0x49] sm:$0xff]  ;;  %v214_v23 = vld [vmem:[%s3520_s0 + $0x51] sm:$0xff]  ;;  %v215_v24 = vld [vmem:[%s3520_s0 + $0x59] sm:$0x7f]  ;;  %v276_v27 = vunpack.c.l.b16 %v267_v25  ;;  %vm445_vm11 = vcmask 441633  }
  0x15   :  { %99 = vrot.lane.b32.xlu0 %v3057_v3, %s2975_s17  ;;  %172 = vrot.lane.b32.xlu1 %v160_v4, %s2976_s20  ;;  %68 = vst.msk [vmem:[#allocation2 + $0x38] sm:$0xff] %vm60_vm0, %v2977_v12  ;;  %v2715_v30 = vld [vmem:[%s3521_s1] sm:$0xff]  ;;  %v151_v44 = vld [vmem:[%s3520_s0 + $0x28] sm:$0x7f]  ;;  %vm447_vm12 = vcmask 441632   ;;  %vm549_vm13 = vcmask 293888  }
  0x16   :  { %103 = vrot.lane.b32.xlu2 %v3065_v5, %s2975_s17  ;;  %69 = vst.msk [vmem:[#allocation2 + $0x40] sm:$0xff] %vm60_vm0, %v2977_v12  ;;  %v278_v28 = vpack.c.b16 %v276_v27, %v276_v27  ;;  %v203_v61 = vld [vmem:[%s3520_s0 + $0x58] sm:$0x7f]  ;;  %vm570_vm14 = vcmask 286720   ;;  %s2980_s3 = smov 72   ;;  %s2981_s15 = smov 108  }
  0x17   :  { %70 = vst.msk [vmem:[#allocation2 + $0x48] sm:$0xff] %vm60_vm0, %v2977_v12  ;;  %s2982_s4 = smov 52   ;;  %s2983_s16 = smov 88   ;;  %vm578_vm15 = vcmask 581920  }
  0x18   :  { %71 = vst.msk [vmem:[#allocation2 + $0x50] sm:$0xff] %vm60_vm0, %v2977_v12  ;;  %v300_v29 = vsel %vm298_vm1, %v278_v28, 0  ;;  %s2984_s18 = smov 32   ;;  %s2985_s19 = smov 68   ;;  %vm599_vm1 = vcmask 1041248  }
  0x19   :  { %72 = vst.msk [vmem:[#allocation2 + $0x58] sm:$0xff] %vm60_vm0, %v2977_v12  ;;  %308 = vmatpush.bf16.msra.mxu0 %v300_v29  ;;  %s2986_s21 = smov 124   ;;  %s2987_s22 = smov 104  }
  0x1a   :  { %395 = vst.msk [vmem:[#allocation4] sm:$0xff] %vm394_vm7, %v2977_v12 }
  0x1b   :  { %396 = vst.msk [vmem:[#allocation4 + $0x8] sm:$0xff] %vm394_vm7, %v2977_v12 }
  0x1c   :  { %397 = vst.msk [vmem:[#allocation4 + $0x10] sm:$0xff] %vm394_vm7, %v2977_v12 }
  0x1d   :  { %105 = vrot.lane.b32.xlu0 %v3075_v6, %s2975_s17  ;;  %176 = vrot.lane.b32.xlu1 %v162_v7, %s2976_s20  ;;  %398 = vst.msk [vmem:[#allocation4 + $0x18] sm:$0xff] %vm394_vm7, %v2977_v12 }
  0x1e   :  { %178 = vrot.lane.b32.xlu2 %v163_v8, %s2976_s20  ;;  %309 = vmatpush.bf16.msra.mxu0 %v2715_v30  ;;  %399 = vst.msk [vmem:[#allocation4 + $0x20] sm:$0xff] %vm394_vm7, %v2977_v12 }
  0x1f   :  { %400 = vst.msk [vmem:[#allocation4 + $0x28] sm:$0xff] %vm394_vm7, %v2977_v12  ;;  %v481_v12 = vld [vmem:[%s3522_s2 + $0x18] sm:$0x7] }
  0x25   :  { %107 = vrot.lane.b32.xlu0 %v78_v9, %s2975_s17  ;;  %180 = vrot.lane.b32.xlu1 %v164_v10, %s2976_s20  ;;  %v3253_v10 = vld [vmem:[%s3526_s6] ss:$0 sm:$0xff] }
  0x26   :  { %182 = vrot.lane.b32.xlu2 %v165_v11, %s2976_s20 }
  0x2d   :  { %111 = vrot.lane.b32.xlu1 %v3106_v13, %s2975_s17  ;;  %109 = vrot.lane.b32.xlu0 %v3111_v14, %s2975_s17 }
  0x2e   :  { %113 = vrot.lane.b32.xlu2 %v3120_v15, %s2975_s17 }
  0x35   :  { %224 = vrot.lane.b32.xlu1 %v211_v16, %s2976_s20  ;;  %222 = vrot.lane.b32.xlu0 %v210_v17, %s2976_s20 }
  0x36   :  { %115 = vrot.lane.b32.xlu2 %v3153_v18, %s2975_s17 }
  0x3d   :  { %117 = vrot.lane.b32.xlu0 %v3162_v19, %s2975_s17  ;;  %226 = vrot.lane.b32.xlu1 %v212_v20, %s2976_s20 }
  0x3e   :  { %228 = vrot.lane.b32.xlu2 %v213_v21, %s2976_s20 }
  0x45   :  { %119 = vrot.lane.b32.xlu0 %v84_v22, %s2975_s17  ;;  %230 = vrot.lane.b32.xlu1 %v214_v23, %s2976_s20 }
  0x46   :  { %232 = vrot.lane.b32.xlu2 %v215_v24, %s2976_s20 }
  0x68   :  { %v175_v26 = vpop.permute.xlu2 %174 }
  0x70   :  { %v104_v31 = vpop.permute.xlu2 %103 }
  0x71   :  { %137 = vst.msk [vmem:[#allocation2 + $0x18] sm:$0xff] %vm133_vm2, %v104_v31 }
  0x78   :  { %v179_v34 = vpop.permute.xlu2 %178 }
  0x7f   :  { %v98_v32 = vpop.permute.xlu0 %97  ;;  %v102_v33 = vpop.permute.xlu1 %101 }
  0x80   :  { %134 = vst.msk [vmem:[#allocation2] sm:$0xff] %vm133_vm2, %v98_v32  ;;  %v183_v37 = vpop.permute.xlu2 %182 }
  0x81   :  { %136 = vst.msk [vmem:[#allocation2 + $0x10] sm:$0xff] %vm133_vm2, %v102_v33 }
  0x82   :  { %155 = vst.msk [vmem:[#allocation2 + $0x11] sm:$0xff] %vm152_vm3, %v3044_v1 }
  0x87   :  { %v100_v35 = vpop.permute.xlu0 %99  ;;  %v173_v36 = vpop.permute.xlu1 %172 }
  0x88   :  { %135 = vst.msk [vmem:[#allocation2 + $0x8] sm:$0xff] %vm133_vm2, %v100_v35  ;;  %v114_v43 = vpop.permute.xlu2 %113 }
  0x89   :  { %153 = vst.msk [vmem:[#allocation2 + $0x1] sm:$0xff] %vm152_vm3, %v3039_v0 }
  0x8a   :  { %154 = vst.msk [vmem:[#allocation2 + $0x9] sm:$0xff] %vm152_vm3, %v3057_v3 }
  0x8b   :  { %192 = vst.msk [vmem:[#allocation2 + $0x8] sm:$0xff] %vm190_vm4, %v175_v26 }
  0x8c   :  { %191 = vst.msk [vmem:[#allocation2] sm:$0xff] %vm190_vm4, %v173_v36 }
  0x8d   :  { %142 = vst.msk [vmem:[#allocation2 + $0x40] sm:$0xff] %vm133_vm2, %v114_v43 }
  0x8f   :  { %v106_v38 = vpop.permute.xlu0 %105  ;;  %v177_v39 = vpop.permute.xlu1 %176 }
  0x90   :  { %138 = vst.msk [vmem:[#allocation2 + $0x20] sm:$0xff] %vm133_vm2, %v106_v38  ;;  %v116_v47 = vpop.permute.xlu2 %115 }
  0x91   :  { %156 = vst.msk [vmem:[#allocation2 + $0x19] sm:$0xff] %vm152_vm3, %v3065_v5 }
  0x92   :  { %v248_v40 = vld [vmem:[#allocation2 + $0x8] sm:$0xff]  ;;  %194 = vst.msk [vmem:[#allocation2 + $0x18] sm:$0xff] %vm190_vm4, %v179_v34 }
  0x93   :  { %v247_v41 = vld [vmem:[#allocation2] sm:$0xff]  ;;  %193 = vst.msk [vmem:[#allocation2 + $0x10] sm:$0xff] %vm190_vm4, %v177_v39 }
  0x94   :  { %v259_v42 = vpack.c.bf16 %v248_v40, %v247_v41  ;;  %143 = vst.msk [vmem:[#allocation2 + $0x48] sm:$0xff] %vm133_vm2, %v116_v47 }
  0x95   :  { %206 = vst.msk [vmem:[#allocation2 + $0x41] sm:$0xff] %vm152_vm3, %v3120_v15 }
  0x96   :  { %2086 = vmatmul.msk.bf16.vlgmr.msra.gmra.mxu0 %vm60_vm0, %v259_v42 }
  0x97   :  { %v108_v45 = vpop.permute.xlu0 %107  ;;  %v181_v46 = vpop.permute.xlu1 %180 }
  0x98   :  { %139 = vst.msk [vmem:[#allocation2 + $0x28] sm:$0xff] %vm133_vm2, %v108_v45  ;;  %v229_v58 = vpop.permute.xlu2 %228 }
  0x99   :  { %157 = vst.msk [vmem:[#allocation2 + $0x21] sm:$0xff] %vm152_vm3, %v3075_v6  ;;  %v250_v49 = vld [vmem:[#allocation2 + $0x18] sm:$0xff] }
  0x9a   :  { %159 = vst.msk [vmem:[#allocation2 + $0x29] sm:$0x7f] %vm158_vm5, %v151_v44  ;;  %v249_v48 = vld [vmem:[#allocation2 + $0x10] sm:$0xff] }
  0x9b   :  { %197 = vst.msk [vmem:[#allocation2 + $0x28] sm:$0x7f] %vm196_vm6, %v183_v37  ;;  %v260_v52 = vpack.c.bf16 %v250_v49, %v249_v48 }
  0x9c   :  { %195 = vst.msk [vmem:[#allocation2 + $0x20] sm:$0xff] %vm190_vm4, %v181_v46 }
  0x9f   :  { %v112_v50 = vpop.permute.xlu1 %111  ;;  %v110_v51 = vpop.permute.xlu0 %109 }
  0xa0   :  { %141 = vst.msk [vmem:[#allocation2 + $0x38] sm:$0xff] %vm133_vm2, %v112_v50  ;;  %v233_v63 = vpop.permute.xlu2 %232 }
  0xa1   :  { %140 = vst.msk [vmem:[#allocation2 + $0x30] sm:$0xff] %vm133_vm2, %v110_v51 }
  0xa2   :  { %204 = vst.msk [vmem:[#allocation2 + $0x31] sm:$0xff] %vm152_vm3, %v3111_v14  ;;  %v252_v56 = vld [vmem:[#allocation2 + $0x28] sm:$0xff] }
  0xa3   :  { %205 = vst.msk [vmem:[#allocation2 + $0x39] sm:$0xff] %vm152_vm3, %v3106_v13  ;;  %v251_v55 = vld [vmem:[#allocation2 + $0x20] sm:$0xff] }
  0xa4   :  { %v261_v60 = vpack.c.bf16 %v252_v56, %v251_v55 }
  0xa6   :  { %2087 = vmatmul.msk.bf16.gmra.mxu0 %vm60_vm0, %v260_v52 }
  0xa7   :  { %v225_v53 = vpop.permute.xlu1 %224  ;;  %v223_v54 = vpop.permute.xlu0 %222 }
  0xa8   :  { %241 = vst.msk [vmem:[#allocation2 + $0x38] sm:$0xff] %vm190_vm4, %v225_v53 }
  0xa9   :  { %240 = vst.msk [vmem:[#allocation2 + $0x30] sm:$0xff] %vm190_vm4, %v223_v54 }
  0xaf   :  { %v118_v57 = vpop.permute.xlu0 %117  ;;  %v227_v59 = vpop.permute.xlu1 %226  ;;  %v254_v2 = vld [vmem:[#allocation2 + $0x38] sm:$0xff] }
  0xb0   :  { %144 = vst.msk [vmem:[#allocation2 + $0x50] sm:$0xff] %vm133_vm2, %v118_v57  ;;  %v253_v1 = vld [vmem:[#allocation2 + $0x30] sm:$0xff] }
  0xb1   :  { %207 = vst.msk [vmem:[#allocation2 + $0x49] sm:$0xff] %vm152_vm3, %v3153_v18  ;;  %v262_v3 = vpack.c.bf16 %v254_v2, %v253_v1  ;;  %v498_v2 = vunpack.c.l.b16 %v481_v12 }
  0xb2   :  { %243 = vst.msk [vmem:[#allocation2 + $0x48] sm:$0xff] %vm190_vm4, %v229_v58 }
  0xb3   :  { %242 = vst.msk [vmem:[#allocation2 + $0x40] sm:$0xff] %vm190_vm4, %v227_v59 }
  0xb6   :  { %2088 = vmatmul.msk.bf16.gmra.mxu0 %vm60_vm0, %v261_v60 }
  0xb7   :  { %v120_v62 = vpop.permute.xlu0 %119  ;;  %v231_v0 = vpop.permute.xlu1 %230 }
  0xb8   :  { %145 = vst.msk [vmem:[#allocation2 + $0x58] sm:$0xff] %vm133_vm2, %v120_v62  ;;  %vm600_vm2 = vcmask 124930  }
  0xb9   :  { %208 = vst.msk [vmem:[#allocation2 + $0x51] sm:$0xff] %vm152_vm3, %v3162_v19  ;;  %v256_v5 = vld [vmem:[#allocation2 + $0x48] sm:$0xff]  ;;  %vm596_vm3 = vcmask 883712  }
  0xba   :  { %209 = vst.msk [vmem:[#allocation2 + $0x59] sm:$0x7f] %vm158_vm5, %v203_v61  ;;  %v255_v4 = vld [vmem:[#allocation2 + $0x40] sm:$0xff]  ;;  %vm609_vm5 = vcmask 417920  }
  0xbb   :  { %245 = vst.msk [vmem:[#allocation2 + $0x58] sm:$0x7f] %vm196_vm6, %v233_v63  ;;  %v263_v6 = vpack.c.bf16 %v256_v5, %v255_v4  ;;  %v2718_v5 = vld [vmem:[%s3522_s2 + $0x10] sm:$0xff]  ;;  %vm619_vm6 = vcmask 713120  }
  0xbc   :  { %244 = vst.msk [vmem:[#allocation2 + $0x50] sm:$0xff] %vm190_vm4, %v231_v0  ;;  %vm3389_vm4 = vmor %vm600_vm2, %vm599_vm1  ;;  %vm663_vm1 = vcmask 850944   ;;  %vm655_vm2 = vcmask 844320  }
  0xc2   :  { %v258_v8 = vld [vmem:[#allocation2 + $0x58] sm:$0xff] }
  0xc3   :  { %v257_v7 = vld [vmem:[#allocation2 + $0x50] sm:$0xff] }
  0xc4   :  { %v264_v9 = vpack.c.bf16 %v258_v8, %v257_v7  ;;  %v2716_v7 = vld [vmem:[%s3522_s2] sm:$0xff] }
  0xc6   :  { %2089 = vmatmul.msk.bf16.gmra.mxu0 %vm60_vm0, %v262_v3  ;;  %v502_v3 = vpack.c.b16 %v498_v2, %v498_v2 }
  0xc8   :  { %v517_v4 = vsel %vm515_vm8, %v502_v3, 0  ;;  %vm640_vm8 = vcmask 1041376  }
  0xc9   :  { %523 = vmatpush.bf16.msra.mxu1 %v517_v4 }
  0xcd   :  { %524 = vmatpush.bf16.msra.mxu1 %v2718_v5 }
  0xd6   :  { %2090 = vmatmul.msk.bf16.gmra.mxu0 %vm60_vm0, %v263_v6  ;;  %v2717_v6 = vld [vmem:[%s3522_s2 + $0x8] sm:$0xff] }
  0xd7   :  { %525 = vmatpush.bf16.msra.mxu1 %v2717_v6 }
  0xdb   :  { %526 = vmatpush.bf16.msra.mxu1 %v2716_v7 }
  0xe6   :  { %2091 = vmatmul.msk.bf16.gmra.mxu0 %vm60_vm0, %v264_v9 }
 0x113   :  { %v311_v11 = vpop.f32.mrf.mxu0 }
 0x114   :  { %v312_v13 = vadd.f32 %v3253_v10, %v311_v11 }
 0x116   :  { %v341_v14 = vmax.f32 %v312_v13, 0.0 }
 0x118   :  { %353 = vst.msk [vmem:[#allocation3] sm:$0xff] %vm60_vm0, %v341_v14 }
 0x11b   :  { %v313_v15 = vpop.f32.mrf.mxu0 }
 0x11c   :  { %v314_v16 = vadd.f32 %v3253_v10, %v313_v15 }
 0x11e   :  { %v342_v17 = vmax.f32 %v314_v16, 0.0 }
 0x120   :  { %354 = vst.msk [vmem:[#allocation3 + $0x8] sm:$0xff] %vm60_vm0, %v342_v17 }
 0x123   :  { %v316_v18 = vpop.f32.mrf.mxu0 }
 0x124   :  { %v317_v19 = vadd.f32 %v3253_v10, %v316_v18 }
 0x126   :  { %v343_v20 = vmax.f32 %v317_v19, 0.0 }
 0x127   :  { %v365_v21 = vld [vmem:[#allocation3] ss:$2 sm:$0xff]  ;;  %v377_v22 = vld [vmem:[#allocation3 + $0x1] ss:$2 sm:$0xff] }
 0x128   :  { %355 = vst.msk [vmem:[#allocation3 + $0x10] sm:$0xff] %vm60_vm0, %v343_v20  ;;  %v3261_v23 = vmax.f32 %v365_v21, %v377_v22 }
 0x12a   :  { %407 = vrot.lane.b32.xlu0 %v3261_v23, %s2978_s26 }
 0x12b   :  { %v318_v24 = vpop.f32.mrf.mxu0 }
 0x12c   :  { %v319_v25 = vadd.f32 %v3253_v10, %v318_v24 }
 0x12e   :  { %v344_v26 = vmax.f32 %v319_v25, 0.0 }
 0x130   :  { %356 = vst.msk [vmem:[#allocation3 + $0x18] sm:$0xff] %vm60_vm0, %v344_v26 }
 0x132   :  { %436 = vrot.lane.b32.xlu0 %v3261_v23, %s2979_s27 }
 0x133   :  { %v321_v27 = vpop.f32.mrf.mxu0 }
 0x134   :  { %v322_v28 = vadd.f32 %v3253_v10, %v321_v27 }
 0x136   :  { %v345_v29 = vmax.f32 %v322_v28, 0.0 }
 0x137   :  { %v367_v30 = vld [vmem:[#allocation3 + $0x10] ss:$2 sm:$0xff]  ;;  %v379_v31 = vld [vmem:[#allocation3 + $0x11] ss:$2 sm:$0xff] }
 0x138   :  { %357 = vst.msk [vmem:[#allocation3 + $0x20] sm:$0xff] %vm60_vm0, %v345_v29  ;;  %v3271_v32 = vmax.f32 %v367_v30, %v379_v31  ;;  %v2888_v30 = vld [vmem:[%s3526_s6 + $0x1] ss:$0 sm:$0xff] }
 0x13a   :  { %409 = vrot.lane.b32.xlu1 %v3271_v32, %s2978_s26 }
 0x13b   :  { %v323_v33 = vpop.f32.mrf.mxu0 }
 0x13c   :  { %v324_v34 = vadd.f32 %v3253_v10, %v323_v33 }
 0x13e   :  { %v346_v35 = vmax.f32 %v324_v34, 0.0 }
 0x140   :  { %358 = vst.msk [vmem:[#allocation3 + $0x28] sm:$0xff] %vm60_vm0, %v346_v35 }
 0x142   :  { %438 = vrot.lane.b32.xlu1 %v3271_v32, %s2979_s27 }
 0x143   :  { %v326_v36 = vpop.f32.mrf.mxu0 }
 0x144   :  { %v327_v37 = vadd.f32 %v3253_v10, %v326_v36 }
 0x146   :  { %v347_v38 = vmax.f32 %v327_v37, 0.0 }
 0x147   :  { %v369_v39 = vld [vmem:[#allocation3 + $0x20] ss:$2 sm:$0xff]  ;;  %v381_v40 = vld [vmem:[#allocation3 + $0x21] ss:$2 sm:$0xff] }
 0x148   :  { %359 = vst.msk [vmem:[#allocation3 + $0x30] sm:$0xff] %vm60_vm0, %v347_v38  ;;  %v3281_v41 = vmax.f32 %v369_v39, %v381_v40 }
 0x14a   :  { %411 = vrot.lane.b32.xlu2 %v3281_v41, %s2978_s26 }
 0x14b   :  { %v328_v42 = vpop.f32.mrf.mxu0 }
 0x14c   :  { %v329_v43 = vadd.f32 %v3253_v10, %v328_v42 }
 0x14e   :  { %v348_v44 = vmax.f32 %v329_v43, 0.0 }
 0x150   :  { %360 = vst.msk [vmem:[#allocation3 + $0x38] sm:$0xff] %vm60_vm0, %v348_v44 }
 0x152   :  { %440 = vrot.lane.b32.xlu2 %v3281_v41, %s2979_s27 }
 0x153   :  { %v331_v45 = vpop.f32.mrf.mxu0 }
 0x154   :  { %v332_v46 = vadd.f32 %v3253_v10, %v331_v45 }
 0x156   :  { %v349_v47 = vmax.f32 %v332_v46, 0.0 }
 0x157   :  { %v371_v48 = vld [vmem:[#allocation3 + $0x30] ss:$2 sm:$0xff]  ;;  %v383_v49 = vld [vmem:[#allocation3 + $0x31] ss:$2 sm:$0xff] }
 0x158   :  { %361 = vst.msk [vmem:[#allocation3 + $0x40] sm:$0xff] %vm60_vm0, %v349_v47  ;;  %v3291_v50 = vmax.f32 %v371_v48, %v383_v49 }
 0x15a   :  { %413 = vrot.lane.b32.xlu0 %v3291_v50, %s2978_s26 }
 0x15b   :  { %v333_v51 = vpop.f32.mrf.mxu0 }
 0x15c   :  { %v334_v52 = vadd.f32 %v3253_v10, %v333_v51 }
 0x15e   :  { %v350_v53 = vmax.f32 %v334_v52, 0.0 }
 0x160   :  { %362 = vst.msk [vmem:[#allocation3 + $0x48] sm:$0xff] %vm60_vm0, %v350_v53 }
 0x162   :  { %453 = vrot.lane.b32.xlu0 %v3291_v50, %s2979_s27 }
 0x163   :  { %v336_v54 = vpop.f32.mrf.mxu0 }
 0x164   :  { %v337_v55 = vadd.f32 %v3253_v10, %v336_v54 }
 0x166   :  { %v351_v56 = vmax.f32 %v337_v55, 0.0 }
 0x167   :  { %v373_v57 = vld [vmem:[#allocation3 + $0x40] ss:$2 sm:$0xff]  ;;  %v385_v58 = vld [vmem:[#allocation3 + $0x41] ss:$2 sm:$0xff] }
 0x168   :  { %363 = vst.msk [vmem:[#allocation3 + $0x50] sm:$0xff] %vm60_vm0, %v351_v56  ;;  %v392_v59 = vmax.f32 %v373_v57, %v385_v58 }
 0x16a   :  { %415 = vrot.lane.b32.xlu1 %v392_v59, %s2978_s26 }
 0x16b   :  { %v338_v60 = vpop.f32.mrf.mxu0 }
 0x16c   :  { %v339_v61 = vadd.f32 %v3253_v10, %v338_v60 }
 0x16e   :  { %v352_v62 = vmax.f32 %v339_v61, 0.0 }
 0x170   :  { %364 = vst.msk [vmem:[#allocation3 + $0x58] sm:$0xff] %vm60_vm0, %v352_v62 }
 0x172   :  { %455 = vrot.lane.b32.xlu1 %v392_v59, %s2979_s27 }
 0x177   :  { %v375_v63 = vld [vmem:[#allocation3 + $0x50] ss:$2 sm:$0xff]  ;;  %v387_v0 = vld [vmem:[#allocation3 + $0x51] ss:$2 sm:$0xff] }
 0x178   :  { %v393_v1 = vmax.f32 %v375_v63, %v387_v0 }
 0x17a   :  { %417 = vrot.lane.b32.xlu2 %v393_v1, %s2978_s26 }
 0x182   :  { %457 = vrot.lane.b32.xlu2 %v393_v1, %s2979_s27 }
 0x19c   :  { %v408_v8 = vpop.permute.xlu0 %407 }
 0x19d   :  { %426 = vst.msk [vmem:[#allocation4] sm:$0xff] %vm425_vm9, %v408_v8 }
 0x1a4   :  { %v412_v9 = vpop.permute.xlu2 %411  ;;  %v437_v11 = vpop.permute.xlu0 %436 }
 0x1a5   :  { %428 = vst.msk [vmem:[#allocation4 + $0x10] sm:$0xff] %vm425_vm9, %v412_v9 }
 0x1a6   :  { %435 = vst.msk [vmem:[#allocation4 + $0x11] sm:$0x7f] %vm434_vm10, %v3281_v41 }
 0x1ac   :  { %v410_v10 = vpop.permute.xlu1 %409  ;;  %v441_v13 = vpop.permute.xlu2 %440 }
 0x1ad   :  { %427 = vst.msk [vmem:[#allocation4 + $0x8] sm:$0xff] %vm425_vm9, %v410_v10 }
 0x1ae   :  { %432 = vst.msk [vmem:[#allocation4 + $0x1] sm:$0xff] %vm60_vm0, %v3261_v23 }
 0x1af   :  { %433 = vst.msk [vmem:[#allocation4 + $0x9] sm:$0xff] %vm60_vm0, %v3271_v32 }
 0x1b0   :  { %446 = vst.msk [vmem:[#allocation4 - $0x1] sm:$0xfe] %vm445_vm11, %v437_v11 }
 0x1b1   :  { %449 = vst.msk [vmem:[#allocation4 + $0xf] sm:$0xff] %vm447_vm12, %v441_v13 }
 0x1b4   :  { %v439_v14 = vpop.permute.xlu1 %438 }
 0x1b5   :  { %448 = vst.msk [vmem:[#allocation4 + $0x7] sm:$0xff] %vm447_vm12, %v439_v14 }
 0x1b8   :  { %v468_v24 = vld [vmem:[#allocation4 + $0x10] sm:$0xff] }
 0x1bc   :  { %v466_v15 = vld [vmem:[#allocation4] sm:$0xff]  ;;  %v467_v16 = vld [vmem:[#allocation4 + $0x8] sm:$0xff] }
 0x1bd   :  { %v472_v17 = vpack.c.bf16 %v467_v16, %v466_v15 }
 0x1bf   :  { %2104 = vmatmul.msk.bf16.vlgmr.msra.gmra.mxu1 %vm394_vm7, %v472_v17 }
 0x1cc   :  { %v414_v18 = vpop.permute.xlu0 %413 }
 0x1cd   :  { %429 = vst.msk [vmem:[#allocation4 + $0x18] sm:$0xff] %vm425_vm9, %v414_v18 }
 0x1d4   :  { %v418_v19 = vpop.permute.xlu2 %417  ;;  %v454_v21 = vpop.permute.xlu0 %453 }
 0x1d5   :  { %431 = vst.msk [vmem:[#allocation4 + $0x28] sm:$0xff] %vm425_vm9, %v418_v19 }
 0x1d6   :  { %452 = vst.msk [vmem:[#allocation4 + $0x29] sm:$0x7f] %vm434_vm10, %v393_v1  ;;  %vm637_vm10 = vcmask 1014784  }
 0x1dc   :  { %v416_v20 = vpop.permute.xlu1 %415  ;;  %v458_v22 = vpop.permute.xlu2 %457 }
 0x1dd   :  { %430 = vst.msk [vmem:[#allocation4 + $0x20] sm:$0xff] %vm425_vm9, %v416_v20  ;;  %vm641_vm9 = vcmask 256002  }
 0x1de   :  { %450 = vst.msk [vmem:[#allocation4 + $0x19] sm:$0xff] %vm60_vm0, %v3291_v50 }
 0x1df   :  { %451 = vst.msk [vmem:[#allocation4 + $0x21] sm:$0xff] %vm60_vm0, %v392_v59  ;;  %vm586_vm0 = vcmask 877120  }
 0x1e0   :  { %462 = vst.msk [vmem:[#allocation4 + $0x17] sm:$0xfe] %vm445_vm11, %v454_v21  ;;  %vm3401_vm11 = vmor %vm641_vm9, %vm640_vm8 }
 0x1e1   :  { %464 = vst.msk [vmem:[#allocation4 + $0x27] sm:$0xff] %vm447_vm12, %v458_v22 }
 0x1e4   :  { %v456_v23 = vpop.permute.xlu1 %455 }
 0x1e5   :  { %463 = vst.msk [vmem:[#allocation4 + $0x1f] sm:$0xff] %vm447_vm12, %v456_v23  ;;  %vm666_vm12 = vcmask 1041216  }
 0x1e8   :  { %v471_v28 = vld [vmem:[#allocation4 + $0x28] sm:$0xff] }
 0x1ec   :  { %v469_v25 = vld [vmem:[#allocation4 + $0x18] sm:$0xff]  ;;  %v470_v27 = vld [vmem:[#allocation4 + $0x20] sm:$0xff] }
 0x1ed   :  { %v473_v26 = vpack.c.bf16 %v469_v25, %v468_v24  ;;  %v474_v29 = vpack.c.bf16 %v471_v28, %v470_v27 }
 0x1ef   :  { %2105 = vmatmul.msk.bf16.gmra.mxu1 %vm394_vm7, %v473_v26 }
 0x1ff   :  { %2106 = vmatmul.msk.bf16.gmra.mxu1 %vm394_vm7, %v474_v29  ;;  %vm3528_vm7 = vcmask 1008320  }
 0x23c   :  { %v528_v31 = vpop.f32.mrf.mxu1 }
 0x23d   :  { %v529_v32 = vadd.f32 %v2888_v30, %v528_v31 }
 0x23f   :  { %v543_v33 = vmax.f32 %v529_v32, 0.0 }
 0x241   :  { %550 = vst.msk [vmem:[#allocation5] sm:$0xff] %vm549_vm13, %v543_v33 }
 0x244   :  { %v530_v34 = vpop.f32.mrf.mxu1 }
 0x245   :  { %v531_v35 = vadd.f32 %v2888_v30, %v530_v34 }
 0x247   :  { %v544_v36 = vmax.f32 %v531_v35, 0.0 }
 0x249   :  { %551 = vst.msk [vmem:[#allocation5 + $0x8] sm:$0xff] %vm549_vm13, %v544_v36 }
 0x250   :  { %v556_v37 = vld [vmem:[#allocation5] ss:$2 sm:$0xff]  ;;  %v562_v38 = vld [vmem:[#allocation5 + $0x1] ss:$2 sm:$0xff] }
 0x251   :  { %v567_v39 = vmax.f32 %v556_v37, %v562_v38 }
 0x253   :  { %v2107_v40 = vrot.slane %v567_v39, 9  ;;  %580 = vst.sshfl [vmem:[#allocation1] sm:$0xff pattern:$0x73625140] %v567_v39 }
 0x254   :  { %571 = vst.msk [vmem:[#allocation6] sm:$0x1] %vm570_vm14, %v567_v39 }
 0x255   :  { %575 = vrot.lane.b32.xlu2 %v2107_v40, %s2979_s27 }
 0x25a   :  { %v582_v41 = vld [vmem:[#allocation1 + $0x1] ss:$4 sm:$0xff] }
 0x25b   :  { %588 = vst.sshfl [vmem:[#allocation1] sm:$0xff pattern:$0x73625140] %v567_v39  ;;  %583 = vrot.lane.b32.xlu1 %v582_v41, %s2980_s3 }
 0x262   :  { %v590_v42 = vld [vmem:[#allocation1 + $0x1] ss:$4 sm:$0xff] }
 0x263   :  { %603 = vst.sshfl [vmem:[#allocation1] sm:$0xff pattern:$0x73625140] %v567_v39  ;;  %v2108_v43 = vrot.slane %v590_v42, 9 }
 0x265   :  { %593 = vrot.lane.b32.xlu0 %v2108_v43, %s2981_s15 }
 0x26a   :  { %v605_v44 = vld [vmem:[#allocation1 + $0x2] ss:$4 sm:$0xff] }
 0x26b   :  { %611 = vst.sshfl [vmem:[#allocation1] sm:$0xff pattern:$0x73625140] %v567_v39 }
 0x26c   :  { %v533_v45 = vpop.f32.mrf.mxu1 }
 0x26d   :  { %v534_v46 = vadd.f32 %v2888_v30, %v533_v45  ;;  %606 = vrot.lane.b32.xlu0 %v605_v44, %s2971_s10 }
 0x26f   :  { %v545_v47 = vmax.f32 %v534_v46, 0.0  ;;  %v2361_v46 = vld [vmem:[#allocation7 + $0x1e0] sm:$0xf] }
 0x271   :  { %552 = vst.msk [vmem:[#allocation5 + $0x10] sm:$0xff] %vm549_vm13, %v545_v47  ;;  %v2781_v47 = vld [vmem:[#allocation7 + $0x1ec] sm:$0xf0] }
 0x272   :  { %v613_v48 = vld [vmem:[#allocation1 + $0x2] ss:$4 sm:$0xff] }
 0x273   :  { %v2109_v49 = vrot.slane %v613_v48, 9  ;;  %621 = vst.sshfl [vmem:[#allocation1] sm:$0xff pattern:$0x73625140] %v567_v39  ;;  %v2489_v48 = vld [vmem:[#allocation7 + $0x2e0] sm:$0xf] }
 0x274   :  { %v535_v50 = vpop.f32.mrf.mxu1 }
 0x275   :  { %v536_v51 = vadd.f32 %v2888_v30, %v535_v50  ;;  %616 = vrot.lane.b32.xlu1 %v2109_v49, %s2982_s4  ;;  %v2362_v50 = vor.u32 %v2781_v47, %v2361_v46  ;;  %v2793_v47 = vld [vmem:[#allocation7 + $0x24c] sm:$0xf0] }
 0x277   :  { %v546_v52 = vmax.f32 %v536_v51, 0.0  ;;  %v2813_v51 = vld [vmem:[#allocation7 + $0x2ec] sm:$0xf0]  ;;  %1467 = vmatpush.bf16.msra.mxu3 %v2362_v50  ;;  %v2177_v50 = vld [vmem:[#allocation7 + $0x68] sm:$0xf] }
 0x279   :  { %553 = vst.msk [vmem:[#allocation5 + $0x18] sm:$0xff] %vm549_vm13, %v546_v52  ;;  %v2490_v52 = vor.u32 %v2813_v51, %v2489_v48  ;;  %v2734_v51 = vld [vmem:[#allocation7 + $0x74] sm:$0xf0] }
 0x27a   :  { %v623_v53 = vld [vmem:[#allocation1 + $0x3] ss:$4 sm:$0xff]  ;;  %v2178_v24 = vor.u32 %v2734_v51, %v2177_v50 }
 0x27b   :  { %624 = vrot.lane.b32.xlu0 %v623_v53, %s2983_s16  ;;  %629 = vst.sshfl [vmem:[#allocation1] sm:$0xff pattern:$0x73625140] %v567_v39  ;;  %1480 = vmatpush.bf16.msrb.mxu1 %v2490_v52  ;;  %v2345_v53 = vld [vmem:[#allocation7 + $0x1c0] sm:$0xf] }
 0x27c   :  { %v538_v54 = vpop.f32.mrf.mxu1  ;;  %v2227_v50 = vld [vmem:[#allocation7 + $0xd8] sm:$0xf0] }
 0x27d   :  { %v539_v55 = vadd.f32 %v2888_v30, %v538_v54  ;;  %v2777_v54 = vld [vmem:[#allocation7 + $0x1cc] sm:$0xf0] }
 0x27f   :  { %v547_v56 = vmax.f32 %v539_v55, 0.0  ;;  %v2473_v55 = vld [vmem:[#allocation7 + $0x2c0] sm:$0xf] }
 0x280   :  { %v558_v57 = vld [vmem:[#allocation5 + $0x10] ss:$2 sm:$0xff]  ;;  %v564_v58 = vld [vmem:[#allocation5 + $0x11] ss:$2 sm:$0xff] }
 0x281   :  { %554 = vst.msk [vmem:[#allocation5 + $0x20] sm:$0xff] %vm549_vm13, %v547_v56  ;;  %v568_v59 = vmax.f32 %v558_v57, %v564_v58  ;;  %v2346_v56 = vor.u32 %v2777_v54, %v2345_v53  ;;  %v2809_v57 = vld [vmem:[#allocation7 + $0x2cc] sm:$0xf0]  ;;  %v2241_v58 = vld [vmem:[#allocation7 + $0xe8] sm:$0xf] }
 0x282   :  { %v631_v60 = vld [vmem:[#allocation1 + $0x3] ss:$4 sm:$0xff] }
 0x283   :  { %645 = vrot.lane.b32.xlu1 %v568_v59, %s2984_s18  ;;  %v2111_v61 = vrot.slane %v568_v59, 9  ;;  %657 = vst.sshfl [vmem:[#allocation1] sm:$0xff pattern:$0x73625140] %v568_v59  ;;  %v2110_v1 = vrot.slane %v631_v60, 9  ;;  %v2474_v60 = vor.u32 %v2809_v57, %v2473_v55  ;;  %1468 = vmatpush.bf16.msra.mxu3 %v2346_v56 }
 0x284   :  { %v540_v62 = vpop.f32.mrf.mxu1  ;;  %v2185_v53 = vld [vmem:[#allocation7 + $0x80] sm:$0xf]  ;;  %v2737_v54 = vld [vmem:[#allocation7 + $0x8c] sm:$0xf0] }
 0x285   :  { %v541_v63 = vadd.f32 %v2888_v30, %v540_v62  ;;  %652 = vrot.lane.b32.xlu0 %v2111_v61, %s2985_s19  ;;  %v2329_v62 = vld [vmem:[#allocation7 + $0x1a0] sm:$0xf]  ;;  %1481 = vmatpush.bf16.msrb.mxu1 %v2474_v60  ;;  %v2186_v55 = vor.u32 %v2737_v54, %v2185_v53  ;;  %v2757_v56 = vld [vmem:[#allocation7 + $0x12c] sm:$0xf0]  ;;  %v2730_v60 = vld [vmem:[#allocation7 + $0x54] sm:$0xf0] }
 0x286   :  { %v2825_v54 = vld [vmem:[#allocation7 + $0x34c] sm:$0xf0] }
 0x287   :  { %v548_v0 = vmax.f32 %v541_v63, 0.0  ;;  %v2773_v63 = vld [vmem:[#allocation7 + $0x1ac] sm:$0xf0] }
 0x289   :  { %555 = vst.msk [vmem:[#allocation5 + $0x28] sm:$0xff] %vm549_vm13, %v548_v0  ;;  %vm667_vm13 = vcmask 92162   ;;  %v2457_v0 = vld [vmem:[#allocation7 + $0x2a0] sm:$0xf] }
 0x28a   :  { %v659_v12 = vld [vmem:[#allocation1 + $0x1] ss:$4 sm:$0xff] }
 0x28b   :  { %634 = vrot.lane.b32.xlu1 %v2110_v1, %s2986_s21  ;;  %660 = vrot.lane.b32.xlu2 %v659_v12, %s2987_s22  ;;  %670 = vst.sshfl [vmem:[#allocation1] sm:$0xff pattern:$0x73625140] %v568_v59  ;;  %v2330_v1 = vor.u32 %v2773_v63, %v2329_v62  ;;  %v2805_v12 = vld [vmem:[#allocation7 + $0x2ac] sm:$0xf0] }
 0x28c   :  { %v2169_v63 = vld [vmem:[#allocation7 + $0x60] sm:$0xf] }
 0x28d   :  { %1469 = vmatpush.bf16.msra.mxu3 %v2330_v1  ;;  %v2249_v1 = vld [vmem:[#allocation7 + $0x100] sm:$0xf] }
 0x290   :  { %v560_v2 = vld [vmem:[#allocation5 + $0x20] ss:$2 sm:$0xff]  ;;  %v566_v3 = vld [vmem:[#allocation5 + $0x21] ss:$2 sm:$0xff] }
 0x291   :  { %v569_v4 = vmax.f32 %v560_v2, %v566_v3  ;;  %v2225_v2 = vld [vmem:[#allocation7 + $0xc8] sm:$0xf]  ;;  %v2746_v3 = vld [vmem:[#allocation7 + $0xd4] sm:$0xf0] }
 0x292   :  { %v672_v5 = vld [vmem:[#allocation1 + $0x1] ss:$4 sm:$0xff] }
 0x293   :  { %680 = vst.sshfl [vmem:[#allocation1] sm:$0xff pattern:$0x73625140] %v568_v59  ;;  %713 = vrot.lane.b32.xlu2 %v569_v4, %s2971_s10  ;;  %v2115_v6 = vrot.slane %v569_v4, 9  ;;  %v2112_v20 = vrot.slane %v672_v5, 9  ;;  %v2226_v5 = vor.u32 %v2746_v3, %v2225_v2 }
 0x294   :  { %v2753_v2 = vld [vmem:[#allocation7 + $0x10c] sm:$0xf0]  ;;  %v2377_v3 = vld [vmem:[#allocation7 + $0x200] sm:$0xf] }
 0x29a   :  { %v682_v7 = vld [vmem:[#allocation1 + $0x2] ss:$4 sm:$0xff] }
 0x29b   :  { %719 = vrot.lane.b32.xlu2 %v2115_v6, %s2982_s4  ;;  %685 = vst.sshfl [vmem:[#allocation1] sm:$0xff pattern:$0x73625140] %v568_v59  ;;  %v2233_v6 = vld [vmem:[#allocation7 + $0xe0] sm:$0xf] }
 0x29c   :  { %684 = vst.msk [vmem:[#allocation6 + $0x1] sm:$0x1] %vm570_vm14, %v682_v7  ;;  %vm648_vm14 = vcmask 549120   ;;  %v2749_v7 = vld [vmem:[#allocation7 + $0xec] sm:$0xf0] }
 0x2a2   :  { %v687_v8 = vld [vmem:[#allocation1 + $0x2] ss:$4 sm:$0xff] }
 0x2a3   :  { %v2113_v9 = vrot.slane %v687_v8, 9  ;;  %694 = vst.sshfl [vmem:[#allocation1] sm:$0xff pattern:$0x73625140] %v568_v59  ;;  %v2313_v8 = vld [vmem:[#allocation7 + $0x180] sm:$0xf] }
 0x2a5   :  { %690 = vrot.lane.b32.xlu0 %v2113_v9, %s2979_s27  ;;  %v2234_v9 = vor.u32 %v2749_v7, %v2233_v6  ;;  %v2747_v7 = vld [vmem:[#allocation7 + $0xe4] sm:$0xf] }
 0x2a7   :  { %1454 = vmatpush.bf16.msra.mxu2 %v2234_v9  ;;  %v2811_v9 = vld [vmem:[#allocation7 + $0x2e4] sm:$0xf] }
 0x2aa   :  { %v696_v10 = vld [vmem:[#allocation1 + $0x3] ss:$4 sm:$0xff] }
 0x2ab   :  { %697 = vrot.lane.b32.xlu2 %v696_v10, %s2980_s3  ;;  %701 = vst.sshfl [vmem:[#allocation1] sm:$0xff pattern:$0x73625140] %v568_v59  ;;  %v2750_v59 = vld [vmem:[#allocation7 + $0xf4] sm:$0xf0] }
 0x2ac   :  { %v2242_v61 = vor.u32 %v2750_v59, %v2241_v58  ;;  %v2769_v10 = vld [vmem:[#allocation7 + $0x18c] sm:$0xf0]  ;;  %v2161_v59 = vld [vmem:[#allocation7 + $0x48] sm:$0xf] }
 0x2ad   :  { %v2789_v58 = vld [vmem:[#allocation7 + $0x22c] sm:$0xf0]  ;;  %v2162_v62 = vor.u32 %v2730_v60, %v2161_v59  ;;  %v2740_v60 = vld [vmem:[#allocation7 + $0xac] sm:$0xf] }
 0x2ae   :  { %1558 = vmatpush.bf16.msrb.mxu0 %v2242_v61 }
 0x2af   :  { %v576_v11 = vpop.permute.xlu2 %575 }
 0x2b0   :  { %579 = vst.msk [vmem:[#allocation6] sm:$0x1] %vm578_vm15, %v576_v11  ;;  %v2441_v11 = vld [vmem:[#allocation7 + $0x280] sm:$0xf] }
 0x2b2   :  { %v703_v13 = vld [vmem:[#allocation1 + $0x3] ss:$4 sm:$0xff]  ;;  %1559 = vmatpush.bf16.msrb.mxu0 %v2226_v5  ;;  %v2250_v5 = vor.u32 %v2753_v2, %v2249_v1 }
 0x2b3   :  { %v2114_v14 = vrot.slane %v703_v13, 9  ;;  %723 = vst.sshfl [vmem:[#allocation1] sm:$0xff pattern:$0x73625140] %v569_v4  ;;  %v2801_v13 = vld [vmem:[#allocation7 + $0x28c] sm:$0xf0] }
 0x2b4   :  { %v2731_v1 = vld [vmem:[#allocation7 + $0x64] sm:$0xf] }
 0x2b5   :  { %706 = vrot.lane.b32.xlu1 %v2114_v14, %s2981_s15  ;;  %v2209_v14 = vld [vmem:[#allocation7 + $0xa8] sm:$0xf] }
 0x2ba   :  { %v725_v15 = vld [vmem:[#allocation1 + $0x1] ss:$4 sm:$0xff] }
 0x2bb   :  { %730 = vst.sshfl [vmem:[#allocation1] sm:$0xff pattern:$0x73625140] %v569_v4 }
 0x2bd   :  { %726 = vrot.lane.b32.xlu1 %v725_v15, %s2983_s16  ;;  %v2742_v15 = vld [vmem:[#allocation7 + $0xb4] sm:$0xf0] }
 0x2c2   :  { %v732_v16 = vld [vmem:[#allocation1 + $0x1] ss:$4 sm:$0xff] }
 0x2c3   :  { %v2116_v17 = vrot.slane %v732_v16, 9  ;;  %741 = vst.sshfl [vmem:[#allocation1] sm:$0xff pattern:$0x73625140] %v569_v4  ;;  %v2314_v16 = vor.u32 %v2769_v10, %v2313_v8  ;;  %v2235_v8 = vld [vmem:[#allocation7 + $0xf0] sm:$0xf0] }
 0x2c4   :  { %v2238_v10 = vor.u32 %v2747_v7, %v2235_v8  ;;  %v2195_v8 = vld [vmem:[#allocation7 + $0x98] sm:$0xf0] }
 0x2c5   :  { %735 = vrot.lane.b32.xlu0 %v2116_v17, %s2986_s21  ;;  %v2442_v17 = vor.u32 %v2801_v13, %v2441_v11  ;;  %1470 = vmatpush.bf16.msra.mxu3 %v2314_v16  ;;  %v2491_v11 = vld [vmem:[#allocation7 + $0x2f0] sm:$0xf0]  ;;  %v2145_v13 = vld [vmem:[#allocation7 + $0x28] sm:$0xf] }
 0x2ca   :  { %v743_v18 = vld [vmem:[#allocation1 + $0x2] ss:$4 sm:$0xff] }
 0x2cb   :  { %744 = vrot.lane.b32.xlu2 %v743_v18, %s2984_s18  ;;  %748 = vst.sshfl [vmem:[#allocation1] sm:$0xff pattern:$0x73625140] %v569_v4  ;;  %v2210_v18 = vor.u32 %v2742_v15, %v2209_v14  ;;  %v2726_v14 = vld [vmem:[#allocation7 + $0x34] sm:$0xf0]  ;;  %v2494_v15 = vor.u32 %v2811_v9, %v2491_v11 }
 0x2cc   :  { %v2146_v16 = vor.u32 %v2726_v14, %v2145_v13  ;;  %v2505_v9 = vld [vmem:[#allocation7 + $0x300] sm:$0xf]  ;;  %v2727_v13 = vld [vmem:[#allocation7 + $0x44] sm:$0xf]  ;;  %v2155_v14 = vld [vmem:[#allocation7 + $0x50] sm:$0xf0] }
 0x2cd   :  { %v584_v19 = vpop.permute.xlu1 %583  ;;  %1560 = vmatpush.bf16.msrb.mxu0 %v2210_v18  ;;  %v2153_v18 = vld [vmem:[#allocation7 + $0x40] sm:$0xf] }
 0x2ce   :  { %587 = vst.msk [vmem:[#allocation6] sm:$0x1] %vm586_vm0, %v584_v19 }
 0x2d2   :  { %v750_v21 = vld [vmem:[#allocation1 + $0x2] ss:$4 sm:$0xff] }
 0x2d3   :  { %675 = vrot.lane.b32.xlu2 %v2112_v20, %s2976_s20  ;;  %v2117_v22 = vrot.slane %v750_v21, 9  ;;  %757 = vst.sshfl [vmem:[#allocation1] sm:$0xff pattern:$0x73625140] %v569_v4  ;;  %v2217_v21 = vld [vmem:[#allocation7 + $0xc0] sm:$0xf] }
 0x2d5   :  { %753 = vrot.lane.b32.xlu1 %v2117_v22, %s2985_s19  ;;  %v2745_v22 = vld [vmem:[#allocation7 + $0xcc] sm:$0xf0]  ;;  %s2071_s19 = sshll.u32 %s3527_s7, 4  ;;  %s2072_s19 = int_to_ptr.hbm [resolvable:$true] %s2071_s19 }
 0x2d7   :  { %v594_v23 = vpop.permute.xlu0 %593 }
 0x2d8   :  { %v595_v25 = vrot.slane %v594_v23, 6 }
 0x2da   :  { %v597_v26 = vsel %vm596_vm3, %v595_v25, %v594_v23  ;;  %v759_v27 = vld [vmem:[#allocation1 + $0x3] ss:$4 sm:$0xff] }
 0x2db   :  { %602 = vst.msk [vmem:[#allocation6] sm:$0x5] %vm3389_vm4, %v597_v26  ;;  %760 = vrot.lane.b32.xlu0 %v759_v27, %s2987_s22  ;;  %v2297_v23 = vld [vmem:[#allocation7 + $0x160] sm:$0xf]  ;;  %v2218_v26 = vor.u32 %v2745_v22, %v2217_v21  ;;  %v2765_v27 = vld [vmem:[#allocation7 + $0x16c] sm:$0xf0] }
 0x2dc   :  { %766 = vst.sshfl [vmem:[#allocation1] sm:$0xff pattern:$0x73625140] %v569_v4  ;;  %v2458_v4 = vor.u32 %v2805_v12, %v2457_v0  ;;  %v2733_v0 = vld [vmem:[#allocation7 + $0x6c] sm:$0xf0] }
 0x2dd   :  { %1455 = vmatpush.bf16.msra.mxu2 %v2218_v26  ;;  %v2170_v12 = vor.u32 %v2733_v0, %v2169_v63  ;;  %v2821_v0 = vld [vmem:[#allocation7 + $0x32c] sm:$0xf0] }
 0x2de   :  { %1482 = vmatpush.bf16.msrb.mxu1 %v2458_v4  ;;  %v2785_v4 = vld [vmem:[#allocation7 + $0x20c] sm:$0xf0] }
 0x2df   :  { %v607_v28 = vpop.permute.xlu0 %606  ;;  %v2378_v6 = vor.u32 %v2785_v4, %v2377_v3  ;;  %v2795_v4 = vld [vmem:[#allocation7 + $0x264] sm:$0xf] }
 0x2e0   :  { %610 = vst.msk [vmem:[#allocation6 + $0x2] sm:$0x1] %vm609_vm5, %v607_v28  ;;  %v2425_v28 = vld [vmem:[#allocation7 + $0x260] sm:$0xf] }
 0x2e2   :  { %1483 = vmatpush.bf16.msrb.mxu1 %v2442_v17 }
 0x2e3   :  { %v768_v29 = vld [vmem:[#allocation1 + $0x3] ss:$4 sm:$0xff] }
 0x2e4   :  { %v2118_v30 = vrot.slane %v768_v29, 9  ;;  %v2298_v29 = vor.u32 %v2765_v27, %v2297_v23  ;;  %v2743_v23 = vld [vmem:[#allocation7 + $0xc4] sm:$0xf] }
 0x2e5   :  { %v661_v34 = vpop.permute.xlu2 %660  ;;  %v2807_v27 = vld [vmem:[#allocation7 + $0x2c4] sm:$0xf] }
 0x2e6   :  { %771 = vrot.lane.b32.xlu0 %v2118_v30, %s2976_s20  ;;  %v662_v38 = vrot.slane %v661_v34, 6  ;;  %v2797_v30 = vld [vmem:[#allocation7 + $0x26c] sm:$0xf0]  ;;  %1471 = vmatpush.bf16.msra.mxu3 %v2298_v29  ;;  %v2129_v29 = vld [vmem:[#allocation7 + $0x8] sm:$0xf] }
 0x2e7   :  { %v617_v31 = vpop.permute.xlu1 %616 }
 0x2e8   :  { %620 = vst.msk [vmem:[#allocation6 + $0x2] sm:$0x1] %vm619_vm6, %v617_v31  ;;  %v664_v42 = vsel %vm663_vm1, %v662_v38, %v661_v34  ;;  %v2193_v31 = vld [vmem:[#allocation7 + $0x88] sm:$0xf]  ;;  %v2426_v34 = vor.u32 %v2797_v30, %v2425_v28  ;;  %v2741_v38 = vld [vmem:[#allocation7 + $0xac] sm:$0xf0] }
 0x2e9   :  { %v2475_v28 = vld [vmem:[#allocation7 + $0x2d0] sm:$0xf0] }
 0x2ea   :  { %1484 = vmatpush.bf16.msrb.mxu1 %v2426_v34  ;;  %v2243_v34 = vld [vmem:[#allocation7 + $0xf8] sm:$0xf0] }
 0x2ed   :  { %v625_v32 = vpop.permute.xlu0 %624  ;;  %v3417_v43 = vpop.permute.xlu2 %713 }
 0x2ee   :  { %628 = vst.msk [vmem:[#allocation6 + $0x2] sm:$0x1] %vm3528_vm7, %v625_v32  ;;  %vm3408_vm7 = vmor %vm667_vm13, %vm666_vm12  ;;  %v2738_v32 = vld [vmem:[#allocation7 + $0x94] sm:$0xf0] }
 0x2f5   :  { %v646_v33 = vpop.permute.xlu1 %645  ;;  %v3419_v44 = vpop.permute.xlu2 %719 }
 0x2f7   :  { %v653_v41 = vpop.permute.xlu0 %652 }
 0x2fd   :  { %v635_v35 = vpop.permute.xlu1 %634 }
 0x2fe   :  { %v636_v37 = vrot.slane %v635_v35, 6 }
 0x300   :  { %v638_v39 = vsel %vm637_vm10, %v636_v37, %v635_v35  ;;  %v2194_v35 = vor.u32 %v2738_v32, %v2193_v31  ;;  %v2201_v37 = vld [vmem:[#allocation7 + $0xa0] sm:$0xf]  ;;  %v2478_v31 = vor.u32 %v2807_v27, %v2475_v28  ;;  %v2722_v32 = vld [vmem:[#allocation7 + $0x14] sm:$0xf0]  ;;  %v2723_v27 = vld [vmem:[#allocation7 + $0x24] sm:$0xf] }
 0x301   :  { %643 = vst.msk [vmem:[#allocation6 + $0x2] sm:$0x5] %vm3401_vm11, %v638_v39  ;;  %v2281_v39 = vld [vmem:[#allocation7 + $0x140] sm:$0xf]  ;;  %v2139_v28 = vld [vmem:[#allocation7 + $0x30] sm:$0xf0] }
 0x302   :  { %649 = vst.msk [vmem:[#allocation6 + $0x4] sm:$0x1] %vm648_vm14, %v646_v33  ;;  %1561 = vmatpush.bf16.msrb.mxu0 %v2194_v35  ;;  %v2130_v35 = vor.u32 %v2722_v32, %v2129_v29  ;;  %v2787_v29 = vld [vmem:[#allocation7 + $0x224] sm:$0xf]  ;;  %v2395_v32 = vld [vmem:[#allocation7 + $0x230] sm:$0xf0] }
 0x303   :  { %656 = vst.msk [vmem:[#allocation6 + $0x4] sm:$0x1] %vm655_vm2, %v653_v41  ;;  %v2202_v41 = vor.u32 %v2741_v38, %v2201_v37  ;;  %v2137_v38 = vld [vmem:[#allocation7 + $0x20] sm:$0xf] }
 0x304   :  { %669 = vst.msk [vmem:[#allocation6 + $0x4] sm:$0x5] %vm3408_vm7, %v664_v42  ;;  %v2761_v42 = vld [vmem:[#allocation7 + $0x14c] sm:$0xf0] }
 0x305   :  { %v698_v49 = vpop.permute.xlu2 %697  ;;  %v2282_v46 = vor.u32 %v2761_v42, %v2281_v39  ;;  %1456 = vmatpush.bf16.msra.mxu2 %v2202_v41  ;;  %v2725_v39 = vld [vmem:[#allocation7 + $0x2c] sm:$0xf0]  ;;  %v2739_v42 = vld [vmem:[#allocation7 + $0xa4] sm:$0xf] }
 0x306   :  { %1562 = vmatpush.bf16.msrb.mxu0 %v2178_v24  ;;  %v2138_v41 = vor.u32 %v2725_v39, %v2137_v38  ;;  %v2121_v24 = vld [vmem:[#allocation7] sm:$0xf]  ;;  %v2719_v39 = vld [vmem:[#allocation7 + $0x4] sm:$0xf] }
 0x307   :  { %1472 = vmatpush.bf16.msra.mxu3 %v2282_v46 }
 0x309   :  { %1457 = vmatpush.bf16.msra.mxu2 %v2186_v55 }
 0x30a   :  { %1563 = vmatpush.bf16.msrb.mxu0 %v2162_v62  ;;  %v2521_v62 = vld [vmem:[#allocation7 + $0x320] sm:$0xf] }
 0x30b   :  { %v2522_v2 = vor.u32 %v2821_v0, %v2521_v62 }
 0x30d   :  { %1458 = vmatpush.bf16.msra.mxu2 %v2170_v12  ;;  %v2171_v12 = vld [vmem:[#allocation7 + $0x70] sm:$0xf0] }
 0x30e   :  { %1564 = vmatpush.bf16.msrb.mxu0 %v2146_v16  ;;  %v2174_v3 = vor.u32 %v2731_v1, %v2171_v12  ;;  %v2347_v1 = vld [vmem:[#allocation7 + $0x1d0] sm:$0xf0] }
 0x312   :  { %1565 = vmatpush.bf16.msrb.mxu0 %v2130_v35  ;;  %v2163_v35 = vld [vmem:[#allocation7 + $0x58] sm:$0xf0] }
 0x317   :  { %v691_v45 = vpop.permute.xlu0 %690 }
 0x318   :  { %693 = vst.msk [vmem:[#allocation6 + $0x1] sm:$0x1] %vm578_vm15, %v691_v45  ;;  %vm678_vm15 = vcmask 385120   ;;  %v2409_v45 = vld [vmem:[#allocation7 + $0x240] sm:$0xf] }
 0x319   :  { %700 = vst.msk [vmem:[#allocation6 + $0x1] sm:$0x1] %vm586_vm0, %v698_v49  ;;  %v2410_v49 = vor.u32 %v2793_v47, %v2409_v45  ;;  %vm3535_vm0 = vcmask 1008320   ;;  %v2203_v45 = vld [vmem:[#allocation7 + $0xb0] sm:$0xf0] }
 0x31a   :  { %v2206_v46 = vor.u32 %v2739_v42, %v2203_v45  ;;  %v2803_v47 = vld [vmem:[#allocation7 + $0x2a4] sm:$0xf] }
 0x31b   :  { %1485 = vmatpush.bf16.msrb.mxu1 %v2410_v49  ;;  %v2744_v49 = vld [vmem:[#allocation7 + $0xcc] sm:$0xf]  ;;  %v2783_v42 = vld [vmem:[#allocation7 + $0x204] sm:$0xf] }
 0x31c   :  { %v2230_v51 = vor.u32 %v2744_v49, %v2227_v50  ;;  %v2720_v50 = vld [vmem:[#allocation7 + $0xc] sm:$0xf] }
 0x325   :  { %v3423_v19 = vpop.permute.xlu2 %744 }
 0x327   :  { %v707_v20 = vpop.permute.xlu1 %706 }
 0x328   :  { %v708_v25 = vrot.slane %v707_v20, 6 }
 0x32a   :  { %v709_v33 = vsel %vm596_vm3, %v708_v25, %v707_v20  ;;  %v2729_v20 = vld [vmem:[#allocation7 + $0x4c] sm:$0xf0]  ;;  %v2219_v25 = vld [vmem:[#allocation7 + $0xd0] sm:$0xf0]  ;;  %vm1450_vm3 = vcmask 392192  }
 0x32b   :  { %711 = vst.msk [vmem:[#allocation6 + $0x1] sm:$0x5] %vm3389_vm4, %v709_v33  ;;  %v2154_v22 = vor.u32 %v2729_v20, %v2153_v18  ;;  %v2222_v26 = vor.u32 %v2743_v23, %v2219_v25  ;;  %v2748_v33 = vld [vmem:[#allocation7 + $0xec] sm:$0xf]  ;;  %v2411_v18 = vld [vmem:[#allocation7 + $0x250] sm:$0xf0]  ;;  %v2158_v20 = vor.u32 %v2727_v13, %v2155_v14 }
 0x32c   :  { %716 = vst.msk [vmem:[#allocation6 + $0x3] sm:$0x1] %vm609_vm5, %v3417_v43  ;;  %v2265_v43 = vld [vmem:[#allocation7 + $0x120] sm:$0xf]  ;;  %v2246_v37 = vor.u32 %v2748_v33, %v2243_v34  ;;  %v2179_v23 = vld [vmem:[#allocation7 + $0x78] sm:$0xf0]  ;;  %v2398_v33 = vor.u32 %v2787_v29, %v2395_v32 }
 0x32d   :  { %722 = vst.msk [vmem:[#allocation6 + $0x3] sm:$0x1] %vm619_vm6, %v3419_v44  ;;  %v676_v48 = vpop.permute.xlu2 %675  ;;  %v2393_v44 = vld [vmem:[#allocation7 + $0x220] sm:$0xf]  ;;  %v2266_v57 = vor.u32 %v2757_v56, %v2265_v43  ;;  %1459 = vmatpush.bf16.msra.mxu2 %v2154_v22  ;;  %v2735_v43 = vld [vmem:[#allocation7 + $0x84] sm:$0xf] }
 0x32e   :  { %679 = vst.msk [vmem:[#allocation6 + $0x6] sm:$0x1] %vm678_vm15, %v676_v48  ;;  %v2394_v61 = vor.u32 %v2789_v58, %v2393_v44  ;;  %v2459_v48 = vld [vmem:[#allocation7 + $0x2b0] sm:$0xf0]  ;;  %1610 = vmatpush.bf16.msra.mxu0 %v2246_v37  ;;  %v2799_v44 = vld [vmem:[#allocation7 + $0x284] sm:$0xf] }
 0x32f   :  { %v727_v52 = vpop.permute.xlu1 %726  ;;  %1473 = vmatpush.bf16.msra.mxu3 %v2266_v57  ;;  %v2462_v36 = vor.u32 %v2803_v47, %v2459_v48  ;;  %v2187_v56 = vld [vmem:[#allocation7 + $0x90] sm:$0xf0]  ;;  %v2732_v22 = vld [vmem:[#allocation7 + $0x6c] sm:$0xf]  ;;  %v2771_v13 = vld [vmem:[#allocation7 + $0x1a4] sm:$0xf] }
 0x330   :  { %729 = vst.msk [vmem:[#allocation6 + $0x3] sm:$0x1] %vm3535_vm0, %v727_v52  ;;  %1486 = vmatpush.bf16.msrb.mxu1 %v2394_v61  ;;  %v2721_v52 = vld [vmem:[#allocation7 + $0xc] sm:$0xf0]  ;;  %v2443_v57 = vld [vmem:[#allocation7 + $0x290] sm:$0xf0]  ;;  %v2190_v58 = vor.u32 %v2735_v43, %v2187_v56  ;;  %v2182_v25 = vor.u32 %v2732_v22, %v2179_v23 }
 0x331   :  { %1460 = vmatpush.bf16.msra.mxu2 %v2138_v41  ;;  %v2122_v53 = vor.u32 %v2721_v52, %v2121_v24  ;;  %v2446_v59 = vor.u32 %v2799_v44, %v2443_v57  ;;  %v2211_v61 = vld [vmem:[#allocation7 + $0xb8] sm:$0xf0]  ;;  %v2728_v34 = vld [vmem:[#allocation7 + $0x4c] sm:$0xf]  ;;  %v2123_v41 = vld [vmem:[#allocation7 + $0x10] sm:$0xf0] }
 0x332   :  { %1611 = vmatpush.bf16.msra.mxu0 %v2230_v51  ;;  %v2214_v63 = vor.u32 %v2740_v60, %v2211_v61  ;;  %v2166_v38 = vor.u32 %v2728_v34, %v2163_v35  ;;  %v2126_v45 = vor.u32 %v2719_v39, %v2123_v41  ;;  %v2724_v48 = vld [vmem:[#allocation7 + $0x2c] sm:$0xf]  ;;  %v2131_v51 = vld [vmem:[#allocation7 + $0x18] sm:$0xf0]  ;;  %v2539_v43 = vld [vmem:[#allocation7 + $0x350] sm:$0xf0] }
 0x333   :  { %1474 = vmatpush.bf16.msra.mxu3 %v2250_v5  ;;  %v2427_v5 = vld [vmem:[#allocation7 + $0x270] sm:$0xf0]  ;;  %v2134_v52 = vor.u32 %v2720_v50, %v2131_v51  ;;  %v2775_v56 = vld [vmem:[#allocation7 + $0x1c4] sm:$0xf]  ;;  %v2826_v44 = vld [vmem:[#allocation7 + $0x354] sm:$0xf0] }
 0x334   :  { %1487 = vmatpush.bf16.msrb.mxu1 %v2378_v6  ;;  %v2736_v6 = vld [vmem:[#allocation7 + $0x8c] sm:$0xf]  ;;  %v2430_v7 = vor.u32 %v2795_v4, %v2427_v5  ;;  %v2819_v4 = vld [vmem:[#allocation7 + $0x324] sm:$0xf]  ;;  %v2523_v5 = vld [vmem:[#allocation7 + $0x330] sm:$0xf0] }
 0x335   :  { %1461 = vmatpush.bf16.msra.mxu2 %v2122_v53  ;;  %v2198_v11 = vor.u32 %v2736_v6, %v2195_v8  ;;  %v2779_v53 = vld [vmem:[#allocation7 + $0x1e4] sm:$0xf]  ;;  %v2824_v57 = vld [vmem:[#allocation7 + $0x34c] sm:$0xf]  ;;  %v2529_v6 = vld [vmem:[#allocation7 + $0x328] sm:$0xf] }
 0x336   :  { %1612 = vmatpush.bf16.msra.mxu0 %v2214_v63  ;;  %v2822_v8 = vld [vmem:[#allocation7 + $0x334] sm:$0xf0]  ;;  %v2331_v14 = vld [vmem:[#allocation7 + $0x1b0] sm:$0xf0]  ;;  %v2816_v23 = vld [vmem:[#allocation7 + $0x30c] sm:$0xf] }
 0x337   :  { %v736_v17 = vpop.permute.xlu0 %735  ;;  %1506 = vmatpush.bf16.msrb.mxu3 %v2238_v10  ;;  %v2817_v10 = vld [vmem:[#allocation7 + $0x30c] sm:$0xf0]  ;;  %v2818_v22 = vld [vmem:[#allocation7 + $0x314] sm:$0xf0]  ;;  %v2299_v34 = vld [vmem:[#allocation7 + $0x170] sm:$0xf0] }
 0x338   :  { %v737_v21 = vrot.slane %v736_v17, 6  ;;  %1532 = vmatpush.bf16.msra.mxu1 %v2494_v15  ;;  %v2791_v15 = vld [vmem:[#allocation7 + $0x244] sm:$0xf]  ;;  %v2497_v35 = vld [vmem:[#allocation7 + $0x2e8] sm:$0xf] }
 0x339   :  { %v2780_v39 = vld [vmem:[#allocation7 + $0x1ec] sm:$0xf]  ;;  %v2371_v41 = vld [vmem:[#allocation7 + $0x1f8] sm:$0xf0]  ;;  %v2810_v50 = vld [vmem:[#allocation7 + $0x2d4] sm:$0xf0] }
 0x33a   :  { %v738_v30 = vsel %vm637_vm10, %v737_v21, %v736_v17  ;;  %v2506_v17 = vor.u32 %v2817_v10, %v2505_v9  ;;  %v2414_v21 = vor.u32 %v2791_v15, %v2411_v18  ;;  %1613 = vmatpush.bf16.msra.mxu0 %v2198_v11  ;;  %v2820_v9 = vld [vmem:[#allocation7 + $0x32c] sm:$0xf]  ;;  %v2531_v10 = vld [vmem:[#allocation7 + $0x338] sm:$0xf0]  ;;  %v2350_v11 = vor.u32 %v2775_v56, %v2347_v1  ;;  %v2507_v18 = vld [vmem:[#allocation7 + $0x310] sm:$0xf0] }
 0x33b   :  { %740 = vst.msk [vmem:[#allocation6 + $0x3] sm:$0x5] %vm3401_vm11, %v738_v30  ;;  %1507 = vmatpush.bf16.msrb.mxu3 %v2222_v26  ;;  %v2526_v15 = vor.u32 %v2819_v4, %v2523_v5  ;;  %v2776_v51 = vld [vmem:[#allocation7 + $0x1cc] sm:$0xf]  ;;  %v2449_v1 = vld [vmem:[#allocation7 + $0x288] sm:$0xf] }
 0x33c   :  { %747 = vst.msk [vmem:[#allocation6 + $0x5] sm:$0x1] %vm648_vm14, %v3423_v19  ;;  %1533 = vmatpush.bf16.msra.mxu1 %v2478_v31  ;;  %v2537_v19 = vld [vmem:[#allocation7 + $0x340] sm:$0xf]  ;;  %v2142_v31 = vor.u32 %v2723_v27, %v2139_v28  ;;  %v2767_v27 = vld [vmem:[#allocation7 + $0x184] sm:$0xf] }
 0x33d   :  { %v2538_v55 = vor.u32 %v2825_v54, %v2537_v19  ;;  %v2363_v19 = vld [vmem:[#allocation7 + $0x1f0] sm:$0xf0]  ;;  %v2823_v54 = vld [vmem:[#allocation7 + $0x344] sm:$0xf]  ;;  %v2772_v56 = vld [vmem:[#allocation7 + $0x1ac] sm:$0xf] }
 0x33e   :  { %1614 = vmatpush.bf16.msra.mxu0 %v2182_v25  ;;  %v2366_v61 = vor.u32 %v2779_v53, %v2363_v19  ;;  %v2542_v12 = vor.u32 %v2823_v54, %v2539_v43  ;;  %v2515_v25 = vld [vmem:[#allocation7 + $0x318] sm:$0xf0]  ;;  %v2315_v28 = vld [vmem:[#allocation7 + $0x190] sm:$0xf0]  ;;  %v2755_v53 = vld [vmem:[#allocation7 + $0x124] sm:$0xf] }
 0x33f   :  { %1508 = vmatpush.bf16.msrb.mxu3 %v2206_v46  ;;  %1498 = vmatpush.bf16.msrb.mxu2 %v2538_v55  ;;  %v2379_v46 = vld [vmem:[#allocation7 + $0x210] sm:$0xf0]  ;;  %v2545_v55 = vld [vmem:[#allocation7 + $0x348] sm:$0xf]  ;;  %v2318_v32 = vor.u32 %v2767_v27, %v2315_v28  ;;  %v2323_v4 = vld [vmem:[#allocation7 + $0x198] sm:$0xf0] }
 0x340   :  { %1534 = vmatpush.bf16.msra.mxu1 %v2462_v36  ;;  %v2382_v47 = vor.u32 %v2783_v42, %v2379_v46  ;;  %v2147_v36 = vld [vmem:[#allocation7 + $0x38] sm:$0xf0]  ;;  %v2267_v19 = vld [vmem:[#allocation7 + $0x130] sm:$0xf0]  ;;  %v2465_v43 = vld [vmem:[#allocation7 + $0x2a8] sm:$0xf] }
 0x341   :  { %v2150_v49 = vor.u32 %v2724_v48, %v2147_v36  ;;  %v2283_v48 = vld [vmem:[#allocation7 + $0x150] sm:$0xf0]  ;;  %v2374_v36 = vor.u32 %v2780_v39, %v2371_v41  ;;  %v2305_v41 = vld [vmem:[#allocation7 + $0x168] sm:$0xf] }
 0x342   :  { %1615 = vmatpush.bf16.msra.mxu0 %v2166_v38  ;;  %v2814_v38 = vld [vmem:[#allocation7 + $0x2f4] sm:$0xf0] }
 0x343   :  { %1509 = vmatpush.bf16.msrb.mxu3 %v2190_v58  ;;  %1499 = vmatpush.bf16.msrb.mxu2 %v2522_v2  ;;  %v2547_v58 = vld [vmem:[#allocation7 + $0x358] sm:$0xf0]  ;;  %v2498_v46 = vor.u32 %v2814_v38, %v2497_v35 }
 0x344   :  { %1535 = vmatpush.bf16.msra.mxu1 %v2446_v59  ;;  %v2275_v35 = vld [vmem:[#allocation7 + $0x138] sm:$0xf0] }
 0x346   :  { %1616 = vmatpush.bf16.msra.mxu0 %v2150_v49  ;;  %v2481_v49 = vld [vmem:[#allocation7 + $0x2c8] sm:$0xf] }
 0x347   :  { %v754_v16 = vpop.permute.xlu1 %753  ;;  %1510 = vmatpush.bf16.msrb.mxu3 %v2174_v3  ;;  %1500 = vmatpush.bf16.msrb.mxu2 %v2506_v17  ;;  %v2546_v3 = vor.u32 %v2826_v44, %v2545_v55  ;;  %v2815_v17 = vld [vmem:[#allocation7 + $0x304] sm:$0xf]  ;;  %v2806_v55 = vld [vmem:[#allocation7 + $0x2b4] sm:$0xf0]  ;;  %v2339_v44 = vld [vmem:[#allocation7 + $0x1b8] sm:$0xf0] }
 0x348   :  { %756 = vst.msk [vmem:[#allocation6 + $0x5] sm:$0x1] %vm655_vm2, %v754_v16  ;;  %1536 = vmatpush.bf16.msra.mxu1 %v2430_v7  ;;  %v2550_v7 = vor.u32 %v2824_v57, %v2547_v58  ;;  %v2530_v16 = vor.u32 %v2822_v8, %v2529_v6  ;;  %v2510_v29 = vor.u32 %v2815_v17, %v2507_v18 }
 0x349   :  { %v2270_v57 = vor.u32 %v2755_v53, %v2267_v19  ;;  %v2466_v58 = vor.u32 %v2806_v55, %v2465_v43  ;;  %v2758_v53 = vld [vmem:[#allocation7 + $0x134] sm:$0xf0]  ;;  %v2812_v55 = vld [vmem:[#allocation7 + $0x2ec] sm:$0xf] }
 0x34a   :  { %1617 = vmatpush.bf16.msra.mxu0 %v2134_v52  ;;  %v2754_v43 = vld [vmem:[#allocation7 + $0x114] sm:$0xf0] }
 0x34b   :  { %1511 = vmatpush.bf16.msrb.mxu3 %v2158_v20  ;;  %v2513_v20 = vld [vmem:[#allocation7 + $0x308] sm:$0xf] }
 0x34c   :  { %1537 = vmatpush.bf16.msra.mxu1 %v2414_v21  ;;  %v2534_v21 = vor.u32 %v2820_v9, %v2531_v10  ;;  %v2353_v9 = vld [vmem:[#allocation7 + $0x1c8] sm:$0xf]  ;;  %v2778_v10 = vld [vmem:[#allocation7 + $0x1d4] sm:$0xf0] }
 0x34d   :  { %v761_v26 = vpop.permute.xlu0 %760 }
 0x34e   :  { %v762_v30 = vrot.slane %v761_v26, 6 }
 0x34f   :  { %1512 = vmatpush.bf16.msrb.mxu3 %v2142_v31  ;;  %v2518_v31 = vor.u32 %v2816_v23, %v2515_v25  ;;  %v2794_v23 = vld [vmem:[#allocation7 + $0x254] sm:$0xf0]  ;;  %v2760_v25 = vld [vmem:[#allocation7 + $0x14c] sm:$0xf] }
 0x350   :  { %v763_v37 = vsel %vm663_vm1, %v762_v30, %v761_v26  ;;  %1538 = vmatpush.bf16.msra.mxu1 %v2398_v33  ;;  %v2334_v26 = vor.u32 %v2771_v13, %v2331_v14  ;;  %v2514_v30 = vor.u32 %v2818_v22, %v2513_v20  ;;  %v2763_v33 = vld [vmem:[#allocation7 + $0x164] sm:$0xf]  ;;  %v2798_v13 = vld [vmem:[#allocation7 + $0x274] sm:$0xf0]  ;;  %v2764_v14 = vld [vmem:[#allocation7 + $0x16c] sm:$0xf] }
 0x351   :  { %765 = vst.msk [vmem:[#allocation6 + $0x5] sm:$0x5] %vm3408_vm7, %v763_v37  ;;  %v2302_v42 = vor.u32 %v2763_v33, %v2299_v34  ;;  %v2337_v20 = vld [vmem:[#allocation7 + $0x1a8] sm:$0xf]  ;;  %v2790_v33 = vld [vmem:[#allocation7 + $0x234] sm:$0xf0] }
 0x352   :  { %v2417_v22 = vld [vmem:[#allocation7 + $0x248] sm:$0xf]  ;;  %v2756_v34 = vld [vmem:[#allocation7 + $0x12c] sm:$0xf] }
 0x353   :  { %1513 = vmatpush.bf16.msrb.mxu3 %v2126_v45  ;;  %v2418_v28 = vor.u32 %v2794_v23, %v2417_v22  ;;  %v2278_v39 = vor.u32 %v2756_v34, %v2275_v35  ;;  %v2829_v22 = vld [vmem:[#allocation10 + $0x10] sm:$0xff]  ;;  %v2842_v23 = vld [vmem:[#allocation10 + $0x78] sm:$0xff] }
 0x354   :  { %1539 = vmatpush.bf16.msra.mxu1 %v2382_v47  ;;  %v2759_v47 = vld [vmem:[#allocation7 + $0x144] sm:$0xf]  ;;  %v2837_v34 = vld [vmem:[#allocation10 + $0x50] sm:$0xff] }
 0x355   :  { %v2286_v52 = vor.u32 %v2759_v47, %v2283_v48  ;;  %v2752_v47 = vld [vmem:[#allocation7 + $0x10c] sm:$0xf]  ;;  %v2259_v48 = vld [vmem:[#allocation7 + $0x118] sm:$0xf0]  ;;  %v3477_v35 = vld [vmem:[%s3526_s6 + $0x2] sm:$0xf] }
 0x358   :  { %v772_v24 = vpop.permute.xlu0 %771 }
 0x359   :  { %774 = vst.msk [vmem:[#allocation6 + $0x7] sm:$0x1] %vm678_vm15, %v772_v24  ;;  %v2355_v24 = vld [vmem:[#allocation7 + $0x1d8] sm:$0xf0] }
 0x35a   :  { %v2358_v54 = vor.u32 %v2776_v51, %v2355_v24  ;;  %v2289_v51 = vld [vmem:[#allocation7 + $0x148] sm:$0xf]  ;;  %v2762_v24 = vld [vmem:[#allocation7 + $0x154] sm:$0xf0] }
 0x360   :  { %v778_v40 = vld [vmem:[#allocation6] sm:$0xff] }
 0x361   :  { %780 = vst [vmem:[#allocation1] ss:$4 sm:$0xff] %v778_v40  ;;  %v2482_v40 = vor.u32 %v2810_v50, %v2481_v49  ;;  %v2262_v50 = vor.u32 %v2752_v47, %v2259_v48  ;;  %v2835_v47 = vld [vmem:[#allocation10 + $0x40] sm:$0xff]  ;;  %v2850_v48 = vld [vmem:[#allocation10 + $0xb8] sm:$0xff] }
 0x368   :  { %v781_v59 = vld.sshfl [vmem:[#allocation1] sm:$0xff pattern:$0x73625140]  ;;  %v782_v60 = vld.sshfl [vmem:[#allocation1 + $0x8] sm:$0xff pattern:$0x73625140] }
 0x369   :  { %v3444_v62 = vpack.c.bf16 %v781_v59, %v781_v59  ;;  %v3446_v63 = vpack.c.bf16 %v782_v60, %v782_v60  ;;  %v783_v0 = vld.sshfl [vmem:[#allocation1 + $0x10] sm:$0xff pattern:$0x73625140]  ;;  %v784_v37 = vld.sshfl [vmem:[#allocation1 + $0x18] sm:$0xff pattern:$0x73625140] }
 0x36a   :  { %v3448_v2 = vpack.c.bf16 %v783_v0, %v783_v0  ;;  %v3454_v45 = vpack.c.bf16 %v784_v37, %v784_v37  ;;  %v2751_v59 = vld [vmem:[#allocation7 + $0x104] sm:$0xf]  ;;  %v2251_v60 = vld [vmem:[#allocation7 + $0x110] sm:$0xf0]  ;;  %v2342_v0 = vor.u32 %v2772_v56, %v2339_v44  ;;  %v2499_v56 = vld [vmem:[#allocation7 + $0x2f8] sm:$0xf0] }
 0x36b   :  { %1462 = vmatmul.bf16.vlgmr.msra.gmra.mxu2 %v3444_v62  ;;  %1475 = vmatmul.bf16.vlgmr.msra.gmra.mxu3 %v3446_v63  ;;  %v2254_v5 = vor.u32 %v2751_v59, %v2251_v60  ;;  %v2483_v59 = vld [vmem:[#allocation7 + $0x2d8] sm:$0xf0] }
 0x36c   :  { %1488 = vmatmul.bf16.vlgmr.msrb.gmra.mxu1 %v3448_v2  ;;  %1519 = vmatpush.bf16.msra.mxu2 %v2366_v61  ;;  %v2369_v61 = vld [vmem:[#allocation7 + $0x1e8] sm:$0xf]  ;;  %v2834_v60 = vld [vmem:[#allocation10 + $0x38] sm:$0xff] }
 0x36d   :  { %1566 = vmatmul.bf16.vlgmr.msrb.gmra.mxu0 %v3444_v62  ;;  %1550 = vmatpush.bf16.msra.mxu3 %v2542_v12  ;;  %v2802_v12 = vld [vmem:[#allocation7 + $0x294] sm:$0xf0] }
 0x36e   :  { %1602 = vmatpush.bf16.msrb.mxu1 %v2546_v3  ;;  %1654 = vmatpush.bf16.msrb.mxu0 %v2550_v7  ;;  %v2768_v3 = vld [vmem:[#allocation7 + $0x18c] sm:$0xf]  ;;  %v2450_v7 = vor.u32 %v2802_v12, %v2449_v1 }
 0x36f   :  { %v2326_v8 = vor.u32 %v2768_v3, %v2323_v4  ;;  %v2800_v12 = vld [vmem:[#allocation7 + $0x28c] sm:$0xf]  ;;  %v2451_v3 = vld [vmem:[#allocation7 + $0x298] sm:$0xf0] }
 0x370   :  { %1520 = vmatpush.bf16.msra.mxu2 %v2350_v11  ;;  %v2433_v11 = vld [vmem:[#allocation7 + $0x268] sm:$0xf]  ;;  %v2454_v4 = vor.u32 %v2800_v12, %v2451_v3  ;;  %v2845_v12 = vld [vmem:[#allocation10 + $0x90] sm:$0xff] }
 0x371   :  { %1551 = vmatpush.bf16.msra.mxu3 %v2526_v15  ;;  %v2307_v15 = vld [vmem:[#allocation7 + $0x178] sm:$0xf0]  ;;  %v2434_v17 = vor.u32 %v2798_v13, %v2433_v11  ;;  %v2788_v11 = vld [vmem:[#allocation7 + $0x22c] sm:$0xf] }
 0x372   :  { %1603 = vmatpush.bf16.msrb.mxu1 %v2530_v16  ;;  %1655 = vmatpush.bf16.msrb.mxu0 %v2534_v21  ;;  %v2354_v16 = vor.u32 %v2778_v10, %v2353_v9  ;;  %v2310_v18 = vor.u32 %v2764_v14, %v2307_v15  ;;  %v2774_v21 = vld [vmem:[#allocation7 + $0x1b4] sm:$0xf0]  ;;  %v2419_v9 = vld [vmem:[#allocation7 + $0x258] sm:$0xf0]  ;;  %v2784_v15 = vld [vmem:[#allocation7 + $0x20c] sm:$0xf] }
 0x373   :  { %v2338_v27 = vor.u32 %v2774_v21, %v2337_v20  ;;  %v2403_v13 = vld [vmem:[#allocation7 + $0x238] sm:$0xf0]  ;;  %v2831_v20 = vld [vmem:[#allocation10 + $0x20] sm:$0xff] }
 0x374   :  { %1521 = vmatpush.bf16.msra.mxu2 %v2334_v26  ;;  %v2291_v26 = vld [vmem:[#allocation7 + $0x158] sm:$0xf0]  ;;  %v2406_v14 = vor.u32 %v2788_v11, %v2403_v13  ;;  %v2843_v13 = vld [vmem:[#allocation10 + $0x80] sm:$0xff] }
 0x375   :  { %1552 = vmatpush.bf16.msra.mxu3 %v2510_v29  ;;  %v2294_v29 = vor.u32 %v2760_v25, %v2291_v26  ;;  %v2830_v21 = vld [vmem:[#allocation10 + $0x18] sm:$0xff]  ;;  %v2828_v25 = vld [vmem:[#allocation10 + $0x8] sm:$0xff]  ;;  %v2841_v26 = vld [vmem:[#allocation10 + $0x70] sm:$0xff] }
 0x376   :  { %1604 = vmatpush.bf16.msrb.mxu1 %v2514_v30  ;;  %1656 = vmatpush.bf16.msrb.mxu0 %v2518_v31  ;;  %v2321_v30 = vld [vmem:[#allocation7 + $0x188] sm:$0xf]  ;;  %v2770_v31 = vld [vmem:[#allocation7 + $0x194] sm:$0xf0] }
 0x377   :  { %v2322_v37 = vor.u32 %v2770_v31, %v2321_v30  ;;  %v2838_v31 = vld [vmem:[#allocation10 + $0x58] sm:$0xff] }
 0x378   :  { %1522 = vmatpush.bf16.msra.mxu2 %v2318_v32  ;;  %v2401_v32 = vld [vmem:[#allocation7 + $0x228] sm:$0xf] }
 0x379   :  { %v2402_v38 = vor.u32 %v2790_v33, %v2401_v32 }
 0x37b   :  { %2551 = vmatmul.msk.bf16.vlgmr.msrb.gmra.mxu2 %vm1450_vm3, %v3454_v45  ;;  %1514 = vmatmul.bf16.vlgmr.msrb.gmra.mxu3 %v3444_v62 }
 0x37c   :  { %1523 = vmatpush.bf16.msra.mxu2 %v2302_v42  ;;  %1540 = vmatmul.bf16.vlgmr.msra.gmra.mxu1 %v3448_v2  ;;  %v2766_v42 = vld [vmem:[#allocation7 + $0x174] sm:$0xf0] }
 0x37d   :  { %1618 = vmatmul.bf16.vlgmr.msra.gmra.mxu0 %v3444_v62  ;;  %1584 = vmatpush.bf16.msrb.mxu3 %v2498_v46  ;;  %v2782_v62 = vld [vmem:[#allocation7 + $0x1f4] sm:$0xf0] }
 0x37e   :  { %1623 = vmatpush.bf16.msra.mxu1 %v2374_v36  ;;  %v2370_v6 = vor.u32 %v2782_v62, %v2369_v61  ;;  %v2786_v46 = vld [vmem:[#allocation7 + $0x214] sm:$0xf0]  ;;  %v2306_v36 = vor.u32 %v2766_v42, %v2305_v41  ;;  %v2467_v62 = vld [vmem:[#allocation7 + $0x2b8] sm:$0xf0]  ;;  %1942 = vmatpush.bf16.msra.mxu0 %v2842_v23  ;;  %v2836_v41 = vld [vmem:[#allocation10 + $0x48] sm:$0xff] }
 0x37f   :  { %v2854_v23 = vld [vmem:[#allocation10 + $0xd8] sm:$0xff] }
 0x380   :  { %1524 = vmatpush.bf16.msra.mxu2 %v2286_v52  ;;  %v2290_v52 = vor.u32 %v2762_v24, %v2289_v51  ;;  %v2849_v24 = vld [vmem:[#allocation10 + $0xb0] sm:$0xff] }
 0x381   :  { %1585 = vmatpush.bf16.msrb.mxu3 %v2482_v40  ;;  %v2273_v40 = vld [vmem:[#allocation7 + $0x128] sm:$0xf] }
 0x382   :  { %1624 = vmatpush.bf16.msra.mxu1 %v2358_v54  ;;  %v2274_v19 = vor.u32 %v2758_v53, %v2273_v40  ;;  %v2257_v54 = vld [vmem:[#allocation7 + $0x108] sm:$0xf]  ;;  %1943 = vmatpush.bf16.msra.mxu0 %v2841_v26 }
 0x383   :  { %v2258_v44 = vor.u32 %v2754_v43, %v2257_v54  ;;  %v2848_v54 = vld [vmem:[#allocation10 + $0xa8] sm:$0xff] }
 0x384   :  { %1525 = vmatpush.bf16.msra.mxu2 %v2270_v57  ;;  %v2502_v57 = vor.u32 %v2812_v55, %v2499_v56 }
 0x385   :  { %1586 = vmatpush.bf16.msrb.mxu3 %v2466_v58  ;;  %v2808_v58 = vld [vmem:[#allocation7 + $0x2cc] sm:$0xf] }
 0x386   :  { %1625 = vmatpush.bf16.msra.mxu1 %v2342_v0  ;;  %v2486_v61 = vor.u32 %v2808_v58, %v2483_v59  ;;  %v2804_v0 = vld [vmem:[#allocation7 + $0x2ac] sm:$0xf] }
 0x387   :  { %v2470_v1 = vor.u32 %v2804_v0, %v2467_v62  ;;  %v903_v0 = vperm.slane %v3477_v35, 1 }
 0x388   :  { %1526 = vmatpush.bf16.msra.mxu2 %v2254_v5  ;;  %v2796_v5 = vld [vmem:[#allocation7 + $0x26c] sm:$0xf] }
 0x389   :  { %1587 = vmatpush.bf16.msrb.mxu3 %v2450_v7 }
 0x38a   :  { %1626 = vmatpush.bf16.msra.mxu1 %v2326_v8  ;;  %v2792_v8 = vld [vmem:[#allocation7 + $0x24c] sm:$0xf] }
 0x38b   :  { %1527 = vmatmul.bf16.vlgmr.msra.gmra.mxu2 %v3446_v63  ;;  %2552 = vmatmul.msk.bf16.vlgmr.msra.gmra.mxu3 %vm1450_vm3, %v3454_v45  ;;  %v2422_v10 = vor.u32 %v2792_v8, %v2419_v9 }
 0x38c   :  { %1571 = vmatpush.bf16.msrb.mxu2 %v2370_v6  ;;  %2553 = vmatmul.msk.bf16.vlgmr.msrb.gmra.mxu1 %vm1450_vm3, %v3454_v45  ;;  %v2435_v6 = vld [vmem:[#allocation7 + $0x278] sm:$0xf0] }
 0x38d   :  { %2554 = vmatmul.msk.bf16.vlgmr.msrb.gmra.mxu0 %vm1450_vm3, %v3454_v45  ;;  %1588 = vmatpush.bf16.msrb.mxu3 %v2434_v17  ;;  %v2385_v45 = vld [vmem:[#allocation7 + $0x208] sm:$0xf]  ;;  %v2438_v7 = vor.u32 %v2796_v5, %v2435_v6  ;;  %v2833_v17 = vld [vmem:[#allocation10 + $0x30] sm:$0xff] }
 0x38e   :  { %1627 = vmatpush.bf16.msra.mxu1 %v2310_v18  ;;  %v2386_v49 = vor.u32 %v2786_v46, %v2385_v45  ;;  %v2832_v18 = vld [vmem:[#allocation10 + $0x28] sm:$0xff] }
 0x38f   :  { %v2844_v6 = vld [vmem:[#allocation10 + $0x88] sm:$0xff] }
 0x390   :  { %1572 = vmatpush.bf16.msrb.mxu2 %v2354_v16 }
 0x391   :  { %1589 = vmatpush.bf16.msrb.mxu3 %v2418_v28  ;;  %v2840_v28 = vld [vmem:[#allocation10 + $0x68] sm:$0xff] }
 0x392   :  { %1628 = vmatpush.bf16.msra.mxu1 %v2294_v29  ;;  %1944 = vmatpush.bf16.msra.mxu0 %v2840_v28  ;;  %v904_v28 = vperm.slane %v3477_v35, 2 }
 0x394   :  { %1573 = vmatpush.bf16.msrb.mxu2 %v2338_v27  ;;  %v2827_v27 = vld [vmem:[#allocation10] sm:$0xff] }
 0x395   :  { %1590 = vmatpush.bf16.msrb.mxu3 %v2402_v38 }
 0x396   :  { %1629 = vmatpush.bf16.msra.mxu1 %v2278_v39 }
 0x398   :  { %1574 = vmatpush.bf16.msrb.mxu2 %v2322_v37  ;;  %v902_v37 = vperm.slane %v3477_v35, 0 }
 0x399   :  { %1591 = vmatpush.bf16.msrb.mxu3 %v2386_v49 }
 0x39a   :  { %1630 = vmatpush.bf16.msra.mxu1 %v2262_v50 }
 0x39c   :  { %1575 = vmatpush.bf16.msrb.mxu2 %v2306_v36  ;;  %1592 = vmatmul.bf16.vlgmr.msrb.gmra.mxu3 %v3448_v2  ;;  %v905_v36 = vperm.slane %v3477_v35, 3 }
 0x39d   :  { %1631 = vmatmul.bf16.vlgmr.msra.gmra.mxu1 %v3446_v63  ;;  %1929 = vmatpush.bf16.msra.mxu3 %v2834_v60 }
 0x39e   :  { %1955 = vmatpush.bf16.msrb.mxu1 %v2850_v48 }
 0x3a0   :  { %1576 = vmatpush.bf16.msrb.mxu2 %v2290_v52 }
 0x3a1   :  { %1930 = vmatpush.bf16.msra.mxu3 %v2833_v17 }
 0x3a2   :  { %1956 = vmatpush.bf16.msrb.mxu1 %v2849_v24  ;;  %v2866_v24 = vld [vmem:[%s3525_s5 + $0x38] sm:$0xff] }
 0x3a4   :  { %1577 = vmatpush.bf16.msrb.mxu2 %v2274_v19 }
 0x3a5   :  { %1931 = vmatpush.bf16.msra.mxu3 %v2832_v18 }
 0x3a6   :  { %1957 = vmatpush.bf16.msrb.mxu1 %v2848_v54  ;;  %v2862_v54 = vld [vmem:[%s3525_s5 + $0x18] sm:$0xff] }
 0x3a8   :  { %1578 = vmatpush.bf16.msrb.mxu2 %v2258_v44 }
 0x3a9   :  { %1932 = vmatpush.bf16.msra.mxu3 %v2831_v20  ;;  %v2856_v20 = vld [vmem:[#allocation10 + $0xe8] sm:$0xff] }
 0x3ab   :  { %1579 = vmatmul.bf16.vlgmr.msrb.gmra.mxu2 %v3446_v63  ;;  %v2387_v63 = vld [vmem:[#allocation7 + $0x218] sm:$0xf0] }
 0x3ac   :  { %1636 = vmatpush.bf16.msra.mxu2 %v2502_v57  ;;  %v2390_v16 = vor.u32 %v2784_v15, %v2387_v63  ;;  %v2847_v57 = vld [vmem:[#allocation10 + $0xa0] sm:$0xff]  ;;  %v2857_v63 = vld [vmem:[#allocation10 + $0xf0] sm:$0xff] }
 0x3ad   :  { %1933 = vmatpush.bf16.msra.mxu3 %v2830_v21  ;;  %1958 = vmatpush.bf16.msrb.mxu1 %v2847_v57 }
 0x3b0   :  { %1637 = vmatpush.bf16.msra.mxu2 %v2486_v61  ;;  %v2846_v61 = vld [vmem:[#allocation10 + $0x98] sm:$0xff] }
 0x3b1   :  { %1934 = vmatpush.bf16.msra.mxu3 %v2829_v22  ;;  %1959 = vmatpush.bf16.msrb.mxu1 %v2846_v61  ;;  %v2855_v22 = vld [vmem:[#allocation10 + $0xe0] sm:$0xff] }
 0x3b4   :  { %1638 = vmatpush.bf16.msra.mxu2 %v2470_v1 }
 0x3b5   :  { %1935 = vmatpush.bf16.msra.mxu3 %v2828_v25  ;;  %1960 = vmatpush.bf16.msrb.mxu1 %v2845_v12 }
 0x3b8   :  { %1639 = vmatpush.bf16.msra.mxu2 %v2454_v4 }
 0x3b9   :  { %1936 = vmatpush.bf16.msra.mxu3 %v2827_v27  ;;  %1961 = vmatpush.bf16.msrb.mxu1 %v2844_v6  ;;  %v2853_v27 = vld [vmem:[#allocation10 + $0xd0] sm:$0xff] }
 0x3bc   :  { %1640 = vmatpush.bf16.msra.mxu2 %v2438_v7 }
 0x3bd   :  { %1962 = vmatpush.bf16.msrb.mxu1 %v2843_v13  ;;  %2050 = vmatpush.bf16.msrb.mxu3 %v2866_v24 }
 0x3c0   :  { %1641 = vmatpush.bf16.msra.mxu2 %v2422_v10  ;;  %v2858_v10 = vld [vmem:[#allocation10 + $0xf8] sm:$0xff] }
 0x3c4   :  { %1642 = vmatpush.bf16.msra.mxu2 %v2406_v14 }
 0x3c8   :  { %1643 = vmatpush.bf16.msra.mxu2 %v2390_v16 }
 0x3cb   :  { %1644 = vmatmul.bf16.vlgmr.msra.gmra.mxu2 %v3448_v2  ;;  %v2839_v2 = vld [vmem:[#allocation10 + $0x60] sm:$0xff] }
 0x3cc   :  { %1945 = vmatpush.bf16.msra.mxu0 %v2839_v2  ;;  %1968 = vmatpush.bf16.msrb.mxu2 %v2858_v10 }
 0x3d0   :  { %1946 = vmatpush.bf16.msra.mxu0 %v2838_v31  ;;  %1969 = vmatpush.bf16.msrb.mxu2 %v2857_v63 }
 0x3d4   :  { %1947 = vmatpush.bf16.msra.mxu0 %v2837_v34  ;;  %1970 = vmatpush.bf16.msrb.mxu2 %v2856_v20  ;;  %v2851_v34 = vld [vmem:[#allocation10 + $0xc0] sm:$0xff] }
 0x3d8   :  { %1948 = vmatpush.bf16.msra.mxu0 %v2836_v41  ;;  %1971 = vmatpush.bf16.msrb.mxu2 %v2855_v22 }
 0x3dc   :  { %1949 = vmatpush.bf16.msra.mxu0 %v2835_v47  ;;  %1972 = vmatpush.bf16.msrb.mxu2 %v2854_v23 }
 0x3e0   :  { %1973 = vmatpush.bf16.msrb.mxu2 %v2853_v27 }
 0x3e9   :  { %v1489_v29 = vpop.f32.mrf.mxu1 }
 0x3ea   :  { %v3472_v30 = vpop.f32.mrf.mxu0 }
 0x3eb   :  { %v1568_v31 = vadd.f32 %v3472_v30, %v904_v28 }
 0x3ee   :  { %v1463_v32 = vpop.f32.mrf.mxu2  ;;  %v1476_v33 = vpop.f32.mrf.mxu3 }
 0x3ef   :  { %v1464_v42 = vadd.f32 %v1463_v32, %v902_v37 }
 0x3f1   :  { %v1491_v38 = vpop.f32.mrf.mxu1  ;;  %v1477_v49 = vadd.f32 %v1476_v33, %v1464_v42 }
 0x3f2   :  { %v1569_v39 = vpop.f32.mrf.mxu0 }
 0x3f3   :  { %v1490_v40 = vadd.f32 %v1489_v29, %v1477_v49  ;;  %v2852_v29 = vld [vmem:[#allocation10 + $0xc8] sm:$0xff] }
 0x3f4   :  { %1974 = vmatpush.bf16.msrb.mxu2 %v2852_v29 }
 0x3f6   :  { %v1465_v45 = vpop.f32.mrf.mxu2  ;;  %v1478_v46 = vpop.f32.mrf.mxu3 }
 0x3f8   :  { %1975 = vmatpush.bf16.msrb.mxu2 %v2851_v34 }
 0x3f9   :  { %v1541_v50 = vpop.f32.mrf.mxu1 }
 0x3fa   :  { %v1619_v51 = vpop.f32.mrf.mxu0 }
 0x3fb   :  { %v3481_v52 = vadd.f32 %v1619_v51, %v905_v36 }
 0x3fe   :  { %v1502_v53 = vpop.f32.mrf.mxu2  ;;  %v1515_v19 = vpop.f32.mrf.mxu3 }
 0x3ff   :  { %v1503_v43 = vadd.f32 %v1502_v53, %v1490_v40  ;;  %v1516_v3 = vadd.f32 %v1515_v19, %v903_v0  ;;  %v2865_v40 = vld [vmem:[%s3525_s5 + $0x30] sm:$0xff]  ;;  %v2864_v53 = vld [vmem:[%s3525_s5 + $0x28] sm:$0xff]  ;;  %v2863_v19 = vld [vmem:[%s3525_s5 + $0x20] sm:$0xff] }
 0x400   :  { %2051 = vmatpush.bf16.msrb.mxu3 %v2865_v40 }
 0x401   :  { %v1662_v55 = vmax.f32 %v1503_v43, 0.0  ;;  %v1543_v56 = vpop.f32.mrf.mxu1  ;;  %v2861_v43 = vld [vmem:[%s3525_s5 + $0x10] sm:$0xff] }
 0x402   :  { %v1621_v44 = vpop.f32.mrf.mxu0 }
 0x403   :  { %v1666_v58 = vpack.c.bf16 %v1662_v55, %v1662_v55  ;;  %v2860_v55 = vld [vmem:[%s3525_s5 + $0x8] sm:$0xff]  ;;  %v2859_v44 = vld [vmem:[%s3525_s5] sm:$0xff]  ;;  %s2988_s5 = smov [#allocation12]  }
 0x404   :  { %2052 = vmatpush.bf16.msrb.mxu3 %v2864_v53  ;;  %s2069_s4 = sshll.u32 %s2988_s5, 4  ;;  %s2070_s4 = int_to_ptr.vmem [resolvable:$true] %s2069_s4 }
 0x405   :  { %1937 = vmatmul.bf16.vlgmr.msra.gmra.mxu3 %v1666_v58  ;;  %v2889_v58 = vld [vmem:[%s3526_s6 + $0x6] ss:$0 sm:$0xff] }
 0x406   :  { %v1504_v59 = vpop.f32.mrf.mxu2  ;;  %v1517_v60 = vpop.f32.mrf.mxu3 }
 0x408   :  { %2053 = vmatpush.bf16.msrb.mxu3 %v2863_v19 }
 0x409   :  { %v1606_v62 = vpop.f32.mrf.mxu1 }
 0x40a   :  { %v1658_v1 = vpop.f32.mrf.mxu0 }
 0x40c   :  { %2054 = vmatpush.bf16.msrb.mxu3 %v2862_v54 }
 0x40e   :  { %v1528_v4 = vpop.f32.mrf.mxu2  ;;  %v1554_v5 = vpop.f32.mrf.mxu3 }
 0x40f   :  { %v1529_v7 = vadd.f32 %v1528_v4, %v1516_v3  ;;  %v2890_v4 = vld [vmem:[%s3526_s6 + $0x7] ss:$0 sm:$0xff] }
 0x410   :  { %2055 = vmatpush.bf16.msrb.mxu3 %v2861_v43 }
 0x411   :  { %v1542_v8 = vadd.f32 %v1541_v50, %v1529_v7  ;;  %v1608_v9 = vpop.f32.mrf.mxu1 }
 0x412   :  { %v1660_v11 = vpop.f32.mrf.mxu0 }
 0x413   :  { %v1555_v14 = vadd.f32 %v1554_v5, %v1542_v8 }
 0x414   :  { %2056 = vmatpush.bf16.msrb.mxu3 %v2860_v55 }
 0x415   :  { %v1663_v15 = vmax.f32 %v1555_v14, 0.0 }
 0x416   :  { %v1530_v16 = vpop.f32.mrf.mxu2  ;;  %v1556_v17 = vpop.f32.mrf.mxu3 }
 0x417   :  { %v1667_v18 = vpack.c.bf16 %v1663_v15, %v1663_v15 }
 0x418   :  { %2057 = vmatpush.bf16.msrb.mxu3 %v2859_v44 }
 0x419   :  { %1950 = vmatmul.bf16.vlgmr.msra.gmra.mxu0 %v1667_v18 }
 0x41a   :  { %v1632_v21 = vpop.f32.mrf.mxu1 }
 0x41b   :  { %v1633_v45 = vadd.f32 %v1632_v21, %v3481_v52 }
 0x41f   :  { %v1593_v25 = vpop.f32.mrf.mxu3 }
 0x422   :  { %v1634_v26 = vpop.f32.mrf.mxu1 }
 0x427   :  { %v1595_v2 = vpop.f32.mrf.mxu3 }
 0x42e   :  { %v1580_v32 = vpop.f32.mrf.mxu2 }
 0x42f   :  { %v1581_v33 = vadd.f32 %v1580_v32, %v1568_v31 }
 0x431   :  { %v1594_v37 = vadd.f32 %v1593_v25, %v1581_v33 }
 0x433   :  { %v1607_v38 = vadd.f32 %v1606_v62, %v1594_v37 }
 0x435   :  { %v1664_v39 = vmax.f32 %v1607_v38, 0.0 }
 0x436   :  { %v1582_v41 = vpop.f32.mrf.mxu2 }
 0x437   :  { %v1668_v42 = vpack.c.bf16 %v1664_v39, %v1664_v39 }
 0x439   :  { %1963 = vmatmul.bf16.vlgmr.msrb.gmra.mxu1 %v1668_v42 }
 0x44e   :  { %v1645_v46 = vpop.f32.mrf.mxu2 }
 0x44f   :  { %v1646_v35 = vadd.f32 %v1645_v46, %v1633_v45 }
 0x451   :  { %v1659_v47 = vadd.f32 %v1658_v1, %v1646_v35 }
 0x453   :  { %v1665_v48 = vmax.f32 %v1659_v47, 0.0 }
 0x455   :  { %v1669_v36 = vpack.c.bf16 %v1665_v48, %v1665_v48 }
 0x456   :  { %v1647_v49 = vpop.f32.mrf.mxu2 }
 0x457   :  { %1976 = vmatmul.bf16.vlgmr.msrb.gmra.mxu2 %v1669_v36 }
 0x488   :  { %v1938_v30 = vpop.f32.mrf.mxu3 }
 0x489   :  { %v1939_v59 = vadd.f32 %v2889_v58, %v1938_v30 }
 0x490   :  { %v1940_v50 = vpop.f32.mrf.mxu3 }
 0x496   :  { %v1951_v51 = vpop.f32.mrf.mxu0 }
 0x497   :  { %v1952_v60 = vadd.f32 %v1951_v51, %v1939_v59 }
 0x49e   :  { %v1953_v52 = vpop.f32.mrf.mxu0 }
 0x4b6   :  { %v1964_v56 = vpop.f32.mrf.mxu1 }
 0x4b7   :  { %v1965_v61 = vadd.f32 %v1964_v56, %v1952_v60 }
 0x4be   :  { %v1966_v57 = vpop.f32.mrf.mxu1 }
 0x4da   :  { %v1977_v0 = vpop.f32.mrf.mxu2 }
 0x4db   :  { %v1978_v62 = vadd.f32 %v1977_v0, %v1965_v61 }
 0x4dd   :  { %v1981_v1 = vmax.f32 %v1978_v62, 0.0 }
 0x4df   :  { %v1982_v12 = vpack.c.bf16 %v1981_v1, %v1981_v1 }
 0x4e1   :  { %2058 = vmatmul.bf16.vlgmr.msrb.gmra.mxu3 %v1982_v12 }
 0x4e2   :  { %v1979_v3 = vpop.f32.mrf.mxu2 }
 0x564   :  { %v2059_v5 = vpop.f32.mrf.mxu3 }
 0x565   :  { %v2060_v6 = vadd.f32 %v2890_v4, %v2059_v5 }
 0x567   :  { %2063 = vst [vmem:[#allocation12] sm:$0x3] %v2060_v6 }
 0x568   :  { %2074 = dma.vmem_to_hbm [thread:$0]  %s2070_s4, 32, %s2072_s19, [#allocation9]  }
 0x56c   :  { %v2061_v7 = vpop.f32.mrf.mxu3 }
 0x56d   :  { %2967 = dma.done.wait [#allocation9], 32  }
 0x56e   :  { %2968 = vsyncadd [#allocation9], 4294967264 }
 0x56f   :  { %2079 = vsyncpa [#allocation8], 1 }
 0x570   :  { %2080 = vsyncpa [#allocation11], 1 }
 0x571   :  { %2081 = vsyncpa [#allocation9], 1 }

</bundles_post_ra>
